<compile_context>
chip_gen: v7x
topology: tpu7x:2x2x1
jax: 0.10.0
libtpu: 0.0.40
codegen_flags: <defaults>
</compile_context>

<pallas_src>
import functools
import math

import jax
import jax.numpy as jnp
import numpy as np
from jax.experimental import pallas as pl
from jax.experimental.pallas import tpu as pltpu


# ------------------------------ Fused kernel --------------------------------

def _fused_stc_kernel(alphas_ref,                 # SMEM (H,)
                      x_ref,                      # (1, C, L)        L = T*V
                      pe_ref,                     # (C, L)
                      wqkv_ref, bqkv_ref,         # (2*H*Cq, C), (2*H*Cq, 1)
                      att0_ref,                   # (H, V, V)
                      expand_ref,                 # (V, L)   expand[u,l] = [l%V==u]
                      expandt_ref,                # (L, V)
                      bd_ref,                     # (L, L)   [l1//V == l2//V]
                      wouts_ref, bouts_ref,       # (ks_v*H, O, C), (O, 1)
                      shiftv_ref,                 # (ks_v, L, L)
                      wress_ref, bress_ref,       # (O, C), (O, 1)
                      wff_ref, bff_ref,           # (O, O), (O, 1)
                      wrest_ref, brest_ref,       # (O, O), (O, 1)
                      woutt_ref, boutt_ref,       # (ks_t, O, O), (O, 1)
                      shiftt_ref,                 # (ks_t, L, L)
                      o_ref,                      # (1, O, L)
                      *, inv_scale, slope):
    f32 = jnp.float32
    H, V = att0_ref.shape[0], att0_ref.shape[1]
    Cq = wqkv_ref.shape[0] // (2 * H)
    ks_v = shiftv_ref.shape[0]
    ks_t = shiftt_ref.shape[0]

    def lrelu(v):
        return jnp.where(v >= 0, v, slope * v)

    x = x_ref[0]                                               # (C, L)

    # q/k projection (1x1 conv) with the positional-embedding add fused in.
    qk = jnp.dot(wqkv_ref[...], x + pe_ref[...],
                 preferred_element_type=f32) + bqkv_ref[...]   # (2*H*Cq, L)

    bd = bd_ref[...]
    ex = expand_ref[...]
    ext = expandt_ref[...]

    # ---- per-head spatial attention + value aggregation (stays lane-dense) ----
    head_vals = []
    for h in range(H):
        q = qk[h * Cq:(h + 1) * Cq]                            # (Cq, L)
        k = qk[(H + h) * Cq:(H + h + 1) * Cq]                  # (Cq, L)
        # logits[u,v] = sum_{c,t} q[c,t,u] k[c,t,v]  via frame-block-diag Gram.
        g = jax.lax.dot_general(q, k, (((0,), (0,)), ((), ())),
                                preferred_element_type=f32) * bd          # (L, L)
        logits = jnp.dot(jnp.dot(ex, g, preferred_element_type=f32),
                         ext, preferred_element_type=f32)                 # (V, V)
        att = jnp.tanh(logits * inv_scale) * alphas_ref[h] + att0_ref[h]  # (V, V)
        # A = kron(I_T, att): value aggregation directly in (C, T*V) layout.
        a_big = jnp.dot(jnp.dot(ext, att, preferred_element_type=f32),
                        ex, preferred_element_type=f32) * bd              # (L, L)
        head_vals.append(jnp.dot(x, a_big, preferred_element_type=f32))   # (C, L)

    # ---- spatial residual: 1x1 conv + folded BN (identity weights if C==O) ----
    x_ress = jnp.dot(wress_ref[...], x, preferred_element_type=f32) + bress_ref[...]

    # ---- out_nets: (1, ks_v) conv along V as per-tap shift-matrix matmuls ----
    y = bouts_ref[...]                                         # (O, 1) broadcasts
    for d in range(ks_v):
        z = None
        for h in range(H):
            term = jnp.dot(wouts_ref[d * H + h], head_vals[h],
                           preferred_element_type=f32)         # (O, L)
            z = term if z is None else z + term
        y = y + jnp.dot(z, shiftv_ref[d], preferred_element_type=f32)
    xs1 = lrelu(y + x_ress)

    # ---- ff_net: 1x1 conv + folded BN + residual + LeakyReLU ----
    xs2 = lrelu(jnp.dot(wff_ref[...], xs1, preferred_element_type=f32)
                + bff_ref[...] + x_ress)

    # ---- temporal residual ----
    x_rest = jnp.dot(wrest_ref[...], xs2, preferred_element_type=f32) + brest_ref[...]

    # ---- out_nett: (ks_t, 1) conv along T as per-tap shift-matrix matmuls ----
    yt = boutt_ref[...]
    for d in range(ks_t):
        z = jnp.dot(woutt_ref[d], xs2, preferred_element_type=f32)
        yt = yt + jnp.dot(z, shiftt_ref[d], preferred_element_type=f32)

    o_ref[0] = lrelu(yt + x_rest).astype(o_ref.dtype)


# ------------------------------ Wrapper (JAX) --------------------------------

def sinusoidal_pe(C, T, V):
    pos = jnp.tile(jnp.arange(V, dtype=jnp.float32), T)[:, None]           # (T*V, 1)
    div = jnp.exp(jnp.arange(0, C, 2, dtype=jnp.float32) * (-math.log(10000.0) / C))
    pe = jnp.zeros((T * V, C), jnp.float32)
    pe = pe.at[:, 0::2].set(jnp.sin(pos * div))
    pe = pe.at[:, 1::2].set(jnp.cos(pos * div))
    return pe.reshape(T, V, C).transpose(2, 0, 1)                          # (C, T, V)


def fold_bn(w2d, b, bn, eps=1e-5):
    gamma, beta, mean, var = bn
    s = gamma / jnp.sqrt(var + eps)
    return w2d * s[:, None], (((b - mean) * s) + beta)[:, None]


def _structure_mats(T, V, ks_v, ks_t, pads, padt):
    """Constant selector / shift matrices built host-side (numpy)."""
    L = T * V
    lane = np.arange(L)
    expand = (lane[None, :] % V == np.arange(V)[:, None]).astype(np.float32)   # (V, L)
    bd = (lane[:, None] // V == lane[None, :] // V).astype(np.float32)         # (L, L)
    shift_v = np.zeros((ks_v, L, L), np.float32)
    for d in range(ks_v):
        s = d - pads
        for l in range(L):
            if 0 <= (l % V) + s < V:
                shift_v[d, l + s, l] = 1.0
    shift_t = np.zeros((ks_t, L, L), np.float32)
    for d in range(ks_t):
        s = d - padt
        for l in range(L):
            if 0 <= (l // V) + s < T:
                shift_t[d, l + s * V, l] = 1.0
    return (jnp.asarray(expand), jnp.asarray(expand.T), jnp.asarray(bd),
            jnp.asarray(shift_v), jnp.asarray(shift_t))


def stc_attention_forward(x, p, *, num_heads, qkv_dim, kernel_size):
    N, C, T, V = x.shape
    H, Cq = num_heads, qkv_dim
    L = T * V
    ks_t, ks_v = kernel_size
    pads, padt = (ks_v - 1) // 2, (ks_t - 1) // 2
    O = p['outs']['w'].shape[0]

    x_cl = x.reshape(N, C, L)
    pe_cl = p['pe'].reshape(C, L)
    w_qkv = p['w_qkv'].reshape(2 * H * Cq, C)
    b_qkv = p['b_qkv'][:, None]
    alphas = p['alphas'].reshape(H)
    att0 = p['att0s'].reshape(H, V, V)

    expand, expandt, bd, shift_v, shift_t = _structure_mats(T, V, ks_v, ks_t, pads, padt)

    # BN-folded conv weights, split per tap / per head for the in-kernel decomposition.
    w_s, b_s = fold_bn(p['outs']['w'].reshape(O, H * C * ks_v), p['outs']['b'], p['outs']['bn'])
    w_s = w_s.reshape(O, H, C, ks_v).transpose(3, 1, 0, 2).reshape(ks_v * H, O, C)
    w_f, b_f = fold_bn(p['ff']['w'].reshape(O, O), p['ff']['b'], p['ff']['bn'])
    w_t, b_t = fold_bn(p['outt']['w'].reshape(O, O * ks_t), p['outt']['b'], p['outt']['bn'])
    w_t = w_t.reshape(O, O, ks_t).transpose(2, 0, 1)
    if p['ress'] is None:                      # C == O -> identity residual branches
        w_rs = jnp.eye(O, dtype=jnp.float32)
        b_rs = jnp.zeros((O, 1), jnp.float32)
        w_rt = jnp.eye(O, dtype=jnp.float32)
        b_rt = jnp.zeros((O, 1), jnp.float32)
    else:
        w_rs, b_rs = fold_bn(p['ress']['w'].reshape(O, C), p['ress']['b'], p['ress']['bn'])
        w_rt, b_rt = fold_bn(p['rest']['w'].reshape(O, O), p['rest']['b'], p['rest']['bn'])

    def const(arr):
        ndim = arr.ndim
        return pl.BlockSpec(arr.shape, lambda n, _d=ndim: (0,) * _d)

    in_specs = [
        pl.BlockSpec(memory_space=pltpu.MemorySpace.SMEM),       # alphas
        pl.BlockSpec((1, C, L), lambda n: (n, 0, 0)),            # x (per-sample)
        const(pe_cl), const(w_qkv), const(b_qkv), const(att0),
        const(expand), const(expandt), const(bd),
        const(w_s), const(b_s), const(shift_v),
        const(w_rs), const(b_rs), const(w_f), const(b_f),
        const(w_rt), const(b_rt), const(w_t), const(b_t), const(shift_t),
    ]

    # advisory cost hint for the XLA scheduler around this single custom call
    macs = (2 * H * Cq * C * L
            + H * (Cq * L * L + V * L * L + 2 * V * V * L + V * L * L + C * L * L)
            + O * C * L + ks_v * (H * O * C * L + O * L * L)
            + 2 * O * O * L + ks_t * (O * O * L + O * L * L))
    cost = pl.CostEstimate(flops=2 * N * macs,
                           transcendentals=N * H * V * V,
                           bytes_accessed=4 * (N * (C + O) * L
                                               + L * L * (1 + ks_v + ks_t)))

    out = pl.pallas_call(
        functools.partial(_fused_stc_kernel,
                          inv_scale=1.0 / float(Cq * T), slope=0.1),
        out_shape=jax.ShapeDtypeStruct((N, O, L), jnp.float32),
        grid=(N,),
        in_specs=in_specs,
        out_specs=pl.BlockSpec((1, O, L), lambda n: (n, 0, 0)),
        compiler_params=pltpu.CompilerParams(dimension_semantics=("parallel",)),
        cost_estimate=cost,
    )(alphas, x_cl, pe_cl, w_qkv, b_qkv, att0, expand, expandt, bd,
      w_s, b_s, shift_v, w_rs, b_rs, w_f, b_f, w_rt, b_rt, w_t, b_t, shift_t)

    return out.reshape(N, O, T, V)


# ------------------------------ Params init ----------------------------------

def init_params(key, C, O, Cq, T, V, H, kernel_size):
    ks_t, ks_v = kernel_size
    keys = jax.random.split(key, 12)

    def w_init(k, shape):
        return 0.1 * jax.random.normal(k, shape, dtype=jnp.float32)

    def b_init(k, shape):
        return 0.05 * jax.random.normal(k, shape, dtype=jnp.float32)

    def bn_init(n):
        return (jnp.ones((n,), jnp.float32), jnp.zeros((n,), jnp.float32),
                jnp.zeros((n,), jnp.float32), jnp.ones((n,), jnp.float32))

    params = {
        'pe': sinusoidal_pe(C, T, V),
        'w_qkv': w_init(keys[0], (2 * H * Cq, C, 1, 1)),
        'b_qkv': b_init(keys[1], (2 * H * Cq,)),
        'alphas': jnp.ones((1, H, 1, 1), jnp.float32),
        'att0s': jnp.ones((1, H, V, V), jnp.float32) / V,
        'outs': dict(w=w_init(keys[2], (O, C * H, 1, ks_v)), b=b_init(keys[3], (O,)), bn=bn_init(O)),
        'ff':   dict(w=w_init(keys[4], (O, O, 1, 1)),        b=b_init(keys[5], (O,)), bn=bn_init(O)),
        'outt': dict(w=w_init(keys[6], (O, O, ks_t, 1)),     b=b_init(keys[7], (O,)), bn=bn_init(O)),
    }
    if C != O:
        params['ress'] = dict(w=w_init(keys[8], (O, C, 1, 1)),  b=b_init(keys[9], (O,)),  bn=bn_init(O))
        params['rest'] = dict(w=w_init(keys[10], (O, O, 1, 1)), b=b_init(keys[11], (O,)), bn=bn_init(O))
    else:
        params['ress'] = None
        params['rest'] = None
    return params


# --------------------------- Pure-JAX reference -----------------------------

def _conv2d_ref(x, w, b, padding):
    y = jax.lax.conv_general_dilated(
        x, w, window_strides=(1, 1), padding=padding,
        dimension_numbers=('NCHW', 'OIHW', 'NCHW'),
        precision=jax.lax.Precision.HIGHEST)
    return y + b[None, :, None, None]


def _bn_ref(y, bn, eps=1e-5):
    gamma, beta, mean, var = bn
    s = (gamma / jnp.sqrt(var + eps))[None, :, None, None]
    return (y - mean[None, :, None, None]) * s + beta[None, :, None, None]


def _lrelu(y, slope=0.1):
    return jnp.where(y >= 0, y, slope * y)


def reference_forward(x, p, *, num_heads, qkv_dim, kernel_size):
    N, C, T, V = x.shape
    H, Cq = num_heads, qkv_dim
    ks_t, ks_v = kernel_size
    pads, padt = (ks_v - 1) // 2, (ks_t - 1) // 2
    hp = jax.lax.Precision.HIGHEST

    xs_in = x + p['pe'][None]
    qk = _conv2d_ref(xs_in, p['w_qkv'], p['b_qkv'], 'VALID')
    qk = qk.reshape(N, 2 * H, Cq, T, V)
    q, k = qk[:, :H], qk[:, H:]
    att = jnp.tanh(jnp.einsum('nhctu,nhctv->nhuv', q, k, precision=hp) / (Cq * T)) * p['alphas']
    att = att + p['att0s']
    xs = jnp.einsum('nctu,nhuv->nhctv', x, att, precision=hp).reshape(N, H * C, T, V)

    if p['ress'] is None:
        x_ress = x
    else:
        x_ress = _bn_ref(_conv2d_ref(x, p['ress']['w'], p['ress']['b'], 'VALID'), p['ress']['bn'])

    y = _bn_ref(_conv2d_ref(xs, p['outs']['w'], p['outs']['b'], [(0, 0), (pads, pads)]), p['outs']['bn'])
    xs = _lrelu(y + x_ress)
    y = _bn_ref(_conv2d_ref(xs, p['ff']['w'], p['ff']['b'], 'VALID'), p['ff']['bn'])
    xs = _lrelu(y + x_ress)
    x_rest = xs if p['rest'] is None else _bn_ref(
        _conv2d_ref(xs, p['rest']['w'], p['rest']['b'], 'VALID'), p['rest']['bn'])
    y = _bn_ref(_conv2d_ref(xs, p['outt']['w'], p['outt']['b'], [(padt, padt), (0, 0)]), p['outt']['bn'])
    return _lrelu(y + x_rest)


# ---------------------------------- Main -------------------------------------

if __name__ == "__main__":
    N = 2
    in_channels, out_channels = 4, 8
    qkv_dim, num_heads = 4, 2
    T, V = 8, 16          # num_frames, num_joints -> T*V = 128 lanes
    kernel_size = (3, 3)

    key = jax.random.PRNGKey(0)
    k_params, k_x = jax.random.split(key)
    params = init_params(k_params, in_channels, out_channels, qkv_dim, T, V,
                         num_heads, kernel_size)
    x = jax.random.normal(k_x, (N, in_channels, T, V), dtype=jnp.float32)

    out = stc_attention_forward(x, params, num_heads=num_heads,
                                qkv_dim=qkv_dim, kernel_size=kernel_size)
    out = jax.block_until_ready(out)
    assert out.shape == (N, out_channels, T, V), out.shape

    ref = jax.block_until_ready(
        reference_forward(x, params, num_heads=num_heads,
                          qkv_dim=qkv_dim, kernel_size=kernel_size))
    np.testing.assert_allclose(np.asarray(out), np.asarray(ref), rtol=2e-2, atol=2e-2)
    print("KERNEL_OK")
</pallas_src>

<mosaic_0001>
module attributes {stable_mosaic.version = 11 : i64} {
  func.func @_fused_stc_kernel(%arg0: i32, %arg1: memref<2xf32, #tpu.memory_space<smem>>, %arg2: memref<1x4x128xf32, #tpu.memory_space<vmem>>, %arg3: memref<4x128xf32, #tpu.memory_space<vmem>>, %arg4: memref<16x4xf32, #tpu.memory_space<vmem>>, %arg5: memref<16x1xf32, #tpu.memory_space<vmem>>, %arg6: memref<2x16x16xf32, #tpu.memory_space<vmem>>, %arg7: memref<16x128xf32, #tpu.memory_space<vmem>>, %arg8: memref<128x16xf32, #tpu.memory_space<vmem>>, %arg9: memref<128x128xf32, #tpu.memory_space<vmem>>, %arg10: memref<6x8x4xf32, #tpu.memory_space<vmem>>, %arg11: memref<8x1xf32, #tpu.memory_space<vmem>>, %arg12: memref<3x128x128xf32, #tpu.memory_space<vmem>>, %arg13: memref<8x4xf32, #tpu.memory_space<vmem>>, %arg14: memref<8x1xf32, #tpu.memory_space<vmem>>, %arg15: memref<8x8xf32, #tpu.memory_space<vmem>>, %arg16: memref<8x1xf32, #tpu.memory_space<vmem>>, %arg17: memref<8x8xf32, #tpu.memory_space<vmem>>, %arg18: memref<8x1xf32, #tpu.memory_space<vmem>>, %arg19: memref<3x8x8xf32, #tpu.memory_space<vmem>>, %arg20: memref<8x1xf32, #tpu.memory_space<vmem>>, %arg21: memref<3x128x128xf32, #tpu.memory_space<vmem>>, %arg22: memref<1x8x128xf32, #tpu.memory_space<vmem>>) attributes {dimension_semantics = [#tpu.dimension_semantics<parallel>], iteration_bounds = array<i64: 2>, scalar_prefetch = 0 : i64, scratch_operands = 0 : i64, tpu.core_type = #tpu.core_type<tc>, window_params = [{transform_indices = @transform_0, window_bounds = array<i64: 2>}, {transform_indices = @transform_1, window_bounds = array<i64: 1, 4, 128>}, {pipeline_mode = #tpu.pipeline_mode<synchronous>, transform_indices = @transform_2, window_bounds = array<i64: 4, 128>}, {pipeline_mode = #tpu.pipeline_mode<synchronous>, transform_indices = @transform_3, window_bounds = array<i64: 16, 4>}, {pipeline_mode = #tpu.pipeline_mode<synchronous>, transform_indices = @transform_4, window_bounds = array<i64: 16, 1>}, {pipeline_mode = #tpu.pipeline_mode<synchronous>, transform_indices = @transform_5, window_bounds = array<i64: 2, 16, 16>}, {pipeline_mode = #tpu.pipeline_mode<synchronous>, transform_indices = @transform_6, window_bounds = array<i64: 16, 128>}, {pipeline_mode = #tpu.pipeline_mode<synchronous>, transform_indices = @transform_7, window_bounds = array<i64: 128, 16>}, {pipeline_mode = #tpu.pipeline_mode<synchronous>, transform_indices = @transform_8, window_bounds = array<i64: 128, 128>}, {pipeline_mode = #tpu.pipeline_mode<synchronous>, transform_indices = @transform_9, window_bounds = array<i64: 6, 8, 4>}, {pipeline_mode = #tpu.pipeline_mode<synchronous>, transform_indices = @transform_10, window_bounds = array<i64: 8, 1>}, {pipeline_mode = #tpu.pipeline_mode<synchronous>, transform_indices = @transform_11, window_bounds = array<i64: 3, 128, 128>}, {pipeline_mode = #tpu.pipeline_mode<synchronous>, transform_indices = @transform_12, window_bounds = array<i64: 8, 4>}, {pipeline_mode = #tpu.pipeline_mode<synchronous>, transform_indices = @transform_13, window_bounds = array<i64: 8, 1>}, {pipeline_mode = #tpu.pipeline_mode<synchronous>, transform_indices = @transform_14, window_bounds = array<i64: 8, 8>}, {pipeline_mode = #tpu.pipeline_mode<synchronous>, transform_indices = @transform_15, window_bounds = array<i64: 8, 1>}, {pipeline_mode = #tpu.pipeline_mode<synchronous>, transform_indices = @transform_16, window_bounds = array<i64: 8, 8>}, {pipeline_mode = #tpu.pipeline_mode<synchronous>, transform_indices = @transform_17, window_bounds = array<i64: 8, 1>}, {pipeline_mode = #tpu.pipeline_mode<synchronous>, transform_indices = @transform_18, window_bounds = array<i64: 3, 8, 8>}, {pipeline_mode = #tpu.pipeline_mode<synchronous>, transform_indices = @transform_19, window_bounds = array<i64: 8, 1>}, {pipeline_mode = #tpu.pipeline_mode<synchronous>, transform_indices = @transform_20, window_bounds = array<i64: 3, 128, 128>}, {transform_indices = @transform_21, window_bounds = array<i64: 1, 8, 128>}]} {
    %c0 = arith.constant 0 : index
    %c0_0 = arith.constant 0 : index
    %c0_1 = arith.constant 0 : index
    %0 = vector.load %arg2[%c0, %c0_0, %c0_1] : memref<1x4x128xf32, #tpu.memory_space<vmem>>, vector<1x4x128xf32>
    %1 = vector.shape_cast %0 : vector<1x4x128xf32> to vector<4x128xf32>
    %c0_2 = arith.constant 0 : index
    %c0_3 = arith.constant 0 : index
    %2 = vector.load %arg4[%c0_2, %c0_3] : memref<16x4xf32, #tpu.memory_space<vmem>>, vector<16x4xf32>
    %c0_4 = arith.constant 0 : index
    %c0_5 = arith.constant 0 : index
    %3 = vector.load %arg3[%c0_4, %c0_5] : memref<4x128xf32, #tpu.memory_space<vmem>>, vector<4x128xf32>
    %4 = arith.addf %1, %3 : vector<4x128xf32>
    %cst = arith.constant dense<0.000000e+00> : vector<16x128xf32>
    %5 = tpu.matmul %2, %4, %cst {dimension_numbers = #tpu.dot_dimension_numbers<[1], [0], [0], [1], [0, 0, 1, 1], [], []>} : vector<16x4xf32>, vector<4x128xf32>, vector<16x128xf32> -> vector<16x128xf32>
    %c0_6 = arith.constant 0 : index
    %c0_7 = arith.constant 0 : index
    %6 = vector.load %arg5[%c0_6, %c0_7] : memref<16x1xf32, #tpu.memory_space<vmem>>, vector<16x1xf32>
    %7 = vector.broadcast %6 : vector<16x1xf32> to vector<16x128xf32>
    %8 = arith.addf %5, %7 : vector<16x128xf32>
    %c0_8 = arith.constant 0 : index
    %c0_9 = arith.constant 0 : index
    %9 = vector.load %arg9[%c0_8, %c0_9] : memref<128x128xf32, #tpu.memory_space<vmem>>, vector<128x128xf32>
    %c0_10 = arith.constant 0 : index
    %c0_11 = arith.constant 0 : index
    %10 = vector.load %arg7[%c0_10, %c0_11] : memref<16x128xf32, #tpu.memory_space<vmem>>, vector<16x128xf32>
    %c0_12 = arith.constant 0 : index
    %c0_13 = arith.constant 0 : index
    %11 = vector.load %arg8[%c0_12, %c0_13] : memref<128x16xf32, #tpu.memory_space<vmem>>, vector<128x16xf32>
    %12 = vector.extract_strided_slice %8 {offsets = [0, 0], sizes = [4, 128], strides = [1, 1]} : vector<16x128xf32> to vector<4x128xf32>
    %13 = vector.extract_strided_slice %8 {offsets = [8, 0], sizes = [4, 128], strides = [1, 1]} : vector<16x128xf32> to vector<4x128xf32>
    %cst_14 = arith.constant dense<0.000000e+00> : vector<128x128xf32>
    %14 = tpu.matmul %12, %13, %cst_14 {dimension_numbers = #tpu.dot_dimension_numbers<[0], [0], [1], [1], [0, 1, 1, 1], [], []>} : vector<4x128xf32>, vector<4x128xf32>, vector<128x128xf32> -> vector<128x128xf32>
    %15 = arith.mulf %14, %9 : vector<128x128xf32>
    %cst_15 = arith.constant dense<0.000000e+00> : vector<16x128xf32>
    %16 = tpu.matmul %10, %15, %cst_15 {dimension_numbers = #tpu.dot_dimension_numbers<[1], [0], [0], [1], [0, 0, 1, 1], [], []>} : vector<16x128xf32>, vector<128x128xf32>, vector<16x128xf32> -> vector<16x128xf32>
    %cst_16 = arith.constant dense<0.000000e+00> : vector<16x16xf32>
    %17 = tpu.matmul %16, %11, %cst_16 {dimension_numbers = #tpu.dot_dimension_numbers<[1], [0], [0], [1], [0, 0, 1, 1], [], []>} : vector<16x128xf32>, vector<128x16xf32>, vector<16x16xf32> -> vector<16x16xf32>
    %cst_17 = arith.constant 3.125000e-02 : f32
    %18 = vector.broadcast %cst_17 : f32 to vector<16x16xf32>
    %19 = arith.mulf %17, %18 : vector<16x16xf32>
    %20 = math.tanh %19 : vector<16x16xf32>
    %c0_18 = arith.constant 0 : index
    %21 = memref.load %arg1[%c0_18] : memref<2xf32, #tpu.memory_space<smem>>
    %22 = vector.broadcast %21 : f32 to vector<16x16xf32>
    %23 = arith.mulf %20, %22 : vector<16x16xf32>
    %c0_19 = arith.constant 0 : index
    %c0_20 = arith.constant 0 : index
    %c0_21 = arith.constant 0 : index
    %24 = vector.load %arg6[%c0_19, %c0_20, %c0_21] : memref<2x16x16xf32, #tpu.memory_space<vmem>>, vector<1x16x16xf32>
    %25 = vector.shape_cast %24 : vector<1x16x16xf32> to vector<16x16xf32>
    %26 = arith.addf %23, %25 : vector<16x16xf32>
    %cst_22 = arith.constant dense<0.000000e+00> : vector<128x16xf32>
    %27 = tpu.matmul %11, %26, %cst_22 {dimension_numbers = #tpu.dot_dimension_numbers<[1], [0], [0], [1], [0, 0, 1, 1], [], []>} : vector<128x16xf32>, vector<16x16xf32>, vector<128x16xf32> -> vector<128x16xf32>
    %cst_23 = arith.constant dense<0.000000e+00> : vector<128x128xf32>
    %28 = tpu.matmul %27, %10, %cst_23 {dimension_numbers = #tpu.dot_dimension_numbers<[1], [0], [0], [1], [0, 0, 1, 1], [], []>} : vector<128x16xf32>, vector<16x128xf32>, vector<128x128xf32> -> vector<128x128xf32>
    %29 = arith.mulf %28, %9 : vector<128x128xf32>
    %cst_24 = arith.constant dense<0.000000e+00> : vector<4x128xf32>
    %30 = tpu.matmul %1, %29, %cst_24 {dimension_numbers = #tpu.dot_dimension_numbers<[1], [0], [0], [1], [0, 0, 1, 1], [], []>} : vector<4x128xf32>, vector<128x128xf32>, vector<4x128xf32> -> vector<4x128xf32>
    %31 = vector.extract_strided_slice %8 {offsets = [4, 0], sizes = [4, 128], strides = [1, 1]} : vector<16x128xf32> to vector<4x128xf32>
    %32 = vector.extract_strided_slice %8 {offsets = [12, 0], sizes = [4, 128], strides = [1, 1]} : vector<16x128xf32> to vector<4x128xf32>
    %cst_25 = arith.constant dense<0.000000e+00> : vector<128x128xf32>
    %33 = tpu.matmul %31, %32, %cst_25 {dimension_numbers = #tpu.dot_dimension_numbers<[0], [0], [1], [1], [0, 1, 1, 1], [], []>} : vector<4x128xf32>, vector<4x128xf32>, vector<128x128xf32> -> vector<128x128xf32>
    %34 = arith.mulf %33, %9 : vector<128x128xf32>
    %cst_26 = arith.constant dense<0.000000e+00> : vector<16x128xf32>
    %35 = tpu.matmul %10, %34, %cst_26 {dimension_numbers = #tpu.dot_dimension_numbers<[1], [0], [0], [1], [0, 0, 1, 1], [], []>} : vector<16x128xf32>, vector<128x128xf32>, vector<16x128xf32> -> vector<16x128xf32>
    %cst_27 = arith.constant dense<0.000000e+00> : vector<16x16xf32>
    %36 = tpu.matmul %35, %11, %cst_27 {dimension_numbers = #tpu.dot_dimension_numbers<[1], [0], [0], [1], [0, 0, 1, 1], [], []>} : vector<16x128xf32>, vector<128x16xf32>, vector<16x16xf32> -> vector<16x16xf32>
    %cst_28 = arith.constant 3.125000e-02 : f32
    %37 = vector.broadcast %cst_28 : f32 to vector<16x16xf32>
    %38 = arith.mulf %36, %37 : vector<16x16xf32>
    %39 = math.tanh %38 : vector<16x16xf32>
    %c1 = arith.constant 1 : index
    %40 = memref.load %arg1[%c1] : memref<2xf32, #tpu.memory_space<smem>>
    %41 = vector.broadcast %40 : f32 to vector<16x16xf32>
    %42 = arith.mulf %39, %41 : vector<16x16xf32>
    %c1_29 = arith.constant 1 : index
    %c0_30 = arith.constant 0 : index
    %c0_31 = arith.constant 0 : index
    %43 = vector.load %arg6[%c1_29, %c0_30, %c0_31] : memref<2x16x16xf32, #tpu.memory_space<vmem>>, vector<1x16x16xf32>
    %44 = vector.shape_cast %43 : vector<1x16x16xf32> to vector<16x16xf32>
    %45 = arith.addf %42, %44 : vector<16x16xf32>
    %cst_32 = arith.constant dense<0.000000e+00> : vector<128x16xf32>
    %46 = tpu.matmul %11, %45, %cst_32 {dimension_numbers = #tpu.dot_dimension_numbers<[1], [0], [0], [1], [0, 0, 1, 1], [], []>} : vector<128x16xf32>, vector<16x16xf32>, vector<128x16xf32> -> vector<128x16xf32>
    %cst_33 = arith.constant dense<0.000000e+00> : vector<128x128xf32>
    %47 = tpu.matmul %46, %10, %cst_33 {dimension_numbers = #tpu.dot_dimension_numbers<[1], [0], [0], [1], [0, 0, 1, 1], [], []>} : vector<128x16xf32>, vector<16x128xf32>, vector<128x128xf32> -> vector<128x128xf32>
    %48 = arith.mulf %47, %9 : vector<128x128xf32>
    %cst_34 = arith.constant dense<0.000000e+00> : vector<4x128xf32>
    %49 = tpu.matmul %1, %48, %cst_34 {dimension_numbers = #tpu.dot_dimension_numbers<[1], [0], [0], [1], [0, 0, 1, 1], [], []>} : vector<4x128xf32>, vector<128x128xf32>, vector<4x128xf32> -> vector<4x128xf32>
    %c0_35 = arith.constant 0 : index
    %c0_36 = arith.constant 0 : index
    %50 = vector.load %arg13[%c0_35, %c0_36] : memref<8x4xf32, #tpu.memory_space<vmem>>, vector<8x4xf32>
    %cst_37 = arith.constant dense<0.000000e+00> : vector<8x128xf32>
    %51 = tpu.matmul %50, %1, %cst_37 {dimension_numbers = #tpu.dot_dimension_numbers<[1], [0], [0], [1], [0, 0, 1, 1], [], []>} : vector<8x4xf32>, vector<4x128xf32>, vector<8x128xf32> -> vector<8x128xf32>
    %c0_38 = arith.constant 0 : index
    %c0_39 = arith.constant 0 : index
    %52 = vector.load %arg14[%c0_38, %c0_39] : memref<8x1xf32, #tpu.memory_space<vmem>>, vector<8x1xf32>
    %53 = vector.broadcast %52 : vector<8x1xf32> to vector<8x128xf32>
    %54 = arith.addf %51, %53 : vector<8x128xf32>
    %c0_40 = arith.constant 0 : index
    %c0_41 = arith.constant 0 : index
    %55 = vector.load %arg11[%c0_40, %c0_41] : memref<8x1xf32, #tpu.memory_space<vmem>>, vector<8x1xf32>
    %c0_42 = arith.constant 0 : index
    %c0_43 = arith.constant 0 : index
    %c0_44 = arith.constant 0 : index
    %56 = vector.load %arg10[%c0_42, %c0_43, %c0_44] : memref<6x8x4xf32, #tpu.memory_space<vmem>>, vector<1x8x4xf32>
    %57 = vector.shape_cast %56 : vector<1x8x4xf32> to vector<8x4xf32>
    %cst_45 = arith.constant dense<0.000000e+00> : vector<8x128xf32>
    %58 = tpu.matmul %57, %30, %cst_45 {dimension_numbers = #tpu.dot_dimension_numbers<[1], [0], [0], [1], [0, 0, 1, 1], [], []>} : vector<8x4xf32>, vector<4x128xf32>, vector<8x128xf32> -> vector<8x128xf32>
    %c1_46 = arith.constant 1 : index
    %c0_47 = arith.constant 0 : index
    %c0_48 = arith.constant 0 : index
    %59 = vector.load %arg10[%c1_46, %c0_47, %c0_48] : memref<6x8x4xf32, #tpu.memory_space<vmem>>, vector<1x8x4xf32>
    %60 = vector.shape_cast %59 : vector<1x8x4xf32> to vector<8x4xf32>
    %cst_49 = arith.constant dense<0.000000e+00> : vector<8x128xf32>
    %61 = tpu.matmul %60, %49, %cst_49 {dimension_numbers = #tpu.dot_dimension_numbers<[1], [0], [0], [1], [0, 0, 1, 1], [], []>} : vector<8x4xf32>, vector<4x128xf32>, vector<8x128xf32> -> vector<8x128xf32>
    %62 = arith.addf %58, %61 : vector<8x128xf32>
    %c0_50 = arith.constant 0 : index
    %c0_51 = arith.constant 0 : index
    %c0_52 = arith.constant 0 : index
    %63 = vector.load %arg12[%c0_50, %c0_51, %c0_52] : memref<3x128x128xf32, #tpu.memory_space<vmem>>, vector<1x128x128xf32>
    %64 = vector.shape_cast %63 : vector<1x128x128xf32> to vector<128x128xf32>
    %cst_53 = arith.constant dense<0.000000e+00> : vector<8x128xf32>
    %65 = tpu.matmul %62, %64, %cst_53 {dimension_numbers = #tpu.dot_dimension_numbers<[1], [0], [0], [1], [0, 0, 1, 1], [], []>} : vector<8x128xf32>, vector<128x128xf32>, vector<8x128xf32> -> vector<8x128xf32>
    %66 = vector.broadcast %55 : vector<8x1xf32> to vector<8x128xf32>
    %67 = arith.addf %66, %65 : vector<8x128xf32>
    %c2 = arith.constant 2 : index
    %c0_54 = arith.constant 0 : index
    %c0_55 = arith.constant 0 : index
    %68 = vector.load %arg10[%c2, %c0_54, %c0_55] : memref<6x8x4xf32, #tpu.memory_space<vmem>>, vector<1x8x4xf32>
    %69 = vector.shape_cast %68 : vector<1x8x4xf32> to vector<8x4xf32>
    %cst_56 = arith.constant dense<0.000000e+00> : vector<8x128xf32>
    %70 = tpu.matmul %69, %30, %cst_56 {dimension_numbers = #tpu.dot_dimension_numbers<[1], [0], [0], [1], [0, 0, 1, 1], [], []>} : vector<8x4xf32>, vector<4x128xf32>, vector<8x128xf32> -> vector<8x128xf32>
    %c3 = arith.constant 3 : index
    %c0_57 = arith.constant 0 : index
    %c0_58 = arith.constant 0 : index
    %71 = vector.load %arg10[%c3, %c0_57, %c0_58] : memref<6x8x4xf32, #tpu.memory_space<vmem>>, vector<1x8x4xf32>
    %72 = vector.shape_cast %71 : vector<1x8x4xf32> to vector<8x4xf32>
    %cst_59 = arith.constant dense<0.000000e+00> : vector<8x128xf32>
    %73 = tpu.matmul %72, %49, %cst_59 {dimension_numbers = #tpu.dot_dimension_numbers<[1], [0], [0], [1], [0, 0, 1, 1], [], []>} : vector<8x4xf32>, vector<4x128xf32>, vector<8x128xf32> -> vector<8x128xf32>
    %74 = arith.addf %70, %73 : vector<8x128xf32>
    %c1_60 = arith.constant 1 : index
    %c0_61 = arith.constant 0 : index
    %c0_62 = arith.constant 0 : index
    %75 = vector.load %arg12[%c1_60, %c0_61, %c0_62] : memref<3x128x128xf32, #tpu.memory_space<vmem>>, vector<1x128x128xf32>
    %76 = vector.shape_cast %75 : vector<1x128x128xf32> to vector<128x128xf32>
    %cst_63 = arith.constant dense<0.000000e+00> : vector<8x128xf32>
    %77 = tpu.matmul %74, %76, %cst_63 {dimension_numbers = #tpu.dot_dimension_numbers<[1], [0], [0], [1], [0, 0, 1, 1], [], []>} : vector<8x128xf32>, vector<128x128xf32>, vector<8x128xf32> -> vector<8x128xf32>
    %78 = arith.addf %67, %77 : vector<8x128xf32>
    %c4 = arith.constant 4 : index
    %c0_64 = arith.constant 0 : index
    %c0_65 = arith.constant 0 : index
    %79 = vector.load %arg10[%c4, %c0_64, %c0_65] : memref<6x8x4xf32, #tpu.memory_space<vmem>>, vector<1x8x4xf32>
    %80 = vector.shape_cast %79 : vector<1x8x4xf32> to vector<8x4xf32>
    %cst_66 = arith.constant dense<0.000000e+00> : vector<8x128xf32>
    %81 = tpu.matmul %80, %30, %cst_66 {dimension_numbers = #tpu.dot_dimension_numbers<[1], [0], [0], [1], [0, 0, 1, 1], [], []>} : vector<8x4xf32>, vector<4x128xf32>, vector<8x128xf32> -> vector<8x128xf32>
    %c5 = arith.constant 5 : index
    %c0_67 = arith.constant 0 : index
    %c0_68 = arith.constant 0 : index
    %82 = vector.load %arg10[%c5, %c0_67, %c0_68] : memref<6x8x4xf32, #tpu.memory_space<vmem>>, vector<1x8x4xf32>
    %83 = vector.shape_cast %82 : vector<1x8x4xf32> to vector<8x4xf32>
    %cst_69 = arith.constant dense<0.000000e+00> : vector<8x128xf32>
    %84 = tpu.matmul %83, %49, %cst_69 {dimension_numbers = #tpu.dot_dimension_numbers<[1], [0], [0], [1], [0, 0, 1, 1], [], []>} : vector<8x4xf32>, vector<4x128xf32>, vector<8x128xf32> -> vector<8x128xf32>
    %85 = arith.addf %81, %84 : vector<8x128xf32>
    %c2_70 = arith.constant 2 : index
    %c0_71 = arith.constant 0 : index
    %c0_72 = arith.constant 0 : index
    %86 = vector.load %arg12[%c2_70, %c0_71, %c0_72] : memref<3x128x128xf32, #tpu.memory_space<vmem>>, vector<1x128x128xf32>
    %87 = vector.shape_cast %86 : vector<1x128x128xf32> to vector<128x128xf32>
    %cst_73 = arith.constant dense<0.000000e+00> : vector<8x128xf32>
    %88 = tpu.matmul %85, %87, %cst_73 {dimension_numbers = #tpu.dot_dimension_numbers<[1], [0], [0], [1], [0, 0, 1, 1], [], []>} : vector<8x128xf32>, vector<128x128xf32>, vector<8x128xf32> -> vector<8x128xf32>
    %89 = arith.addf %78, %88 : vector<8x128xf32>
    %90 = arith.addf %89, %54 : vector<8x128xf32>
    %cst_74 = arith.constant 0.000000e+00 : f32
    %91 = vector.broadcast %cst_74 : f32 to vector<8x128xf32>
    %92 = arith.cmpf oge, %90, %91 : vector<8x128xf32>
    %cst_75 = arith.constant 1.000000e-01 : f32
    %93 = vector.broadcast %cst_75 : f32 to vector<8x128xf32>
    %94 = arith.mulf %93, %90 : vector<8x128xf32>
    %95 = arith.select %92, %90, %94 : vector<8x128xi1>, vector<8x128xf32>
    %c0_76 = arith.constant 0 : index
    %c0_77 = arith.constant 0 : index
    %96 = vector.load %arg15[%c0_76, %c0_77] : memref<8x8xf32, #tpu.memory_space<vmem>>, vector<8x8xf32>
    %cst_78 = arith.constant dense<0.000000e+00> : vector<8x128xf32>
    %97 = tpu.matmul %96, %95, %cst_78 {dimension_numbers = #tpu.dot_dimension_numbers<[1], [0], [0], [1], [0, 0, 1, 1], [], []>} : vector<8x8xf32>, vector<8x128xf32>, vector<8x128xf32> -> vector<8x128xf32>
    %c0_79 = arith.constant 0 : index
    %c0_80 = arith.constant 0 : index
    %98 = vector.load %arg16[%c0_79, %c0_80] : memref<8x1xf32, #tpu.memory_space<vmem>>, vector<8x1xf32>
    %99 = vector.broadcast %98 : vector<8x1xf32> to vector<8x128xf32>
    %100 = arith.addf %97, %99 : vector<8x128xf32>
    %101 = arith.addf %100, %54 : vector<8x128xf32>
    %cst_81 = arith.constant 0.000000e+00 : f32
    %102 = vector.broadcast %cst_81 : f32 to vector<8x128xf32>
    %103 = arith.cmpf oge, %101, %102 : vector<8x128xf32>
    %cst_82 = arith.constant 1.000000e-01 : f32
    %104 = vector.broadcast %cst_82 : f32 to vector<8x128xf32>
    %105 = arith.mulf %104, %101 : vector<8x128xf32>
    %106 = arith.select %103, %101, %105 : vector<8x128xi1>, vector<8x128xf32>
    %c0_83 = arith.constant 0 : index
    %c0_84 = arith.constant 0 : index
    %107 = vector.load %arg17[%c0_83, %c0_84] : memref<8x8xf32, #tpu.memory_space<vmem>>, vector<8x8xf32>
    %cst_85 = arith.constant dense<0.000000e+00> : vector<8x128xf32>
    %108 = tpu.matmul %107, %106, %cst_85 {dimension_numbers = #tpu.dot_dimension_numbers<[1], [0], [0], [1], [0, 0, 1, 1], [], []>} : vector<8x8xf32>, vector<8x128xf32>, vector<8x128xf32> -> vector<8x128xf32>
    %c0_86 = arith.constant 0 : index
    %c0_87 = arith.constant 0 : index
    %109 = vector.load %arg18[%c0_86, %c0_87] : memref<8x1xf32, #tpu.memory_space<vmem>>, vector<8x1xf32>
    %110 = vector.broadcast %109 : vector<8x1xf32> to vector<8x128xf32>
    %111 = arith.addf %108, %110 : vector<8x128xf32>
    %c0_88 = arith.constant 0 : index
    %c0_89 = arith.constant 0 : index
    %112 = vector.load %arg20[%c0_88, %c0_89] : memref<8x1xf32, #tpu.memory_space<vmem>>, vector<8x1xf32>
    %c0_90 = arith.constant 0 : index
    %c0_91 = arith.constant 0 : index
    %c0_92 = arith.constant 0 : index
    %113 = vector.load %arg19[%c0_90, %c0_91, %c0_92] : memref<3x8x8xf32, #tpu.memory_space<vmem>>, vector<1x8x8xf32>
    %114 = vector.shape_cast %113 : vector<1x8x8xf32> to vector<8x8xf32>
    %cst_93 = arith.constant dense<0.000000e+00> : vector<8x128xf32>
    %115 = tpu.matmul %114, %106, %cst_93 {dimension_numbers = #tpu.dot_dimension_numbers<[1], [0], [0], [1], [0, 0, 1, 1], [], []>} : vector<8x8xf32>, vector<8x128xf32>, vector<8x128xf32> -> vector<8x128xf32>
    %c0_94 = arith.constant 0 : index
    %c0_95 = arith.constant 0 : index
    %c0_96 = arith.constant 0 : index
    %116 = vector.load %arg21[%c0_94, %c0_95, %c0_96] : memref<3x128x128xf32, #tpu.memory_space<vmem>>, vector<1x128x128xf32>
    %117 = vector.shape_cast %116 : vector<1x128x128xf32> to vector<128x128xf32>
    %cst_97 = arith.constant dense<0.000000e+00> : vector<8x128xf32>
    %118 = tpu.matmul %115, %117, %cst_97 {dimension_numbers = #tpu.dot_dimension_numbers<[1], [0], [0], [1], [0, 0, 1, 1], [], []>} : vector<8x128xf32>, vector<128x128xf32>, vector<8x128xf32> -> vector<8x128xf32>
    %119 = vector.broadcast %112 : vector<8x1xf32> to vector<8x128xf32>
    %120 = arith.addf %119, %118 : vector<8x128xf32>
    %c1_98 = arith.constant 1 : index
    %c0_99 = arith.constant 0 : index
    %c0_100 = arith.constant 0 : index
    %121 = vector.load %arg19[%c1_98, %c0_99, %c0_100] : memref<3x8x8xf32, #tpu.memory_space<vmem>>, vector<1x8x8xf32>
    %122 = vector.shape_cast %121 : vector<1x8x8xf32> to vector<8x8xf32>
    %cst_101 = arith.constant dense<0.000000e+00> : vector<8x128xf32>
    %123 = tpu.matmul %122, %106, %cst_101 {dimension_numbers = #tpu.dot_dimension_numbers<[1], [0], [0], [1], [0, 0, 1, 1], [], []>} : vector<8x8xf32>, vector<8x128xf32>, vector<8x128xf32> -> vector<8x128xf32>
    %c1_102 = arith.constant 1 : index
    %c0_103 = arith.constant 0 : index
    %c0_104 = arith.constant 0 : index
    %124 = vector.load %arg21[%c1_102, %c0_103, %c0_104] : memref<3x128x128xf32, #tpu.memory_space<vmem>>, vector<1x128x128xf32>
    %125 = vector.shape_cast %124 : vector<1x128x128xf32> to vector<128x128xf32>
    %cst_105 = arith.constant dense<0.000000e+00> : vector<8x128xf32>
    %126 = tpu.matmul %123, %125, %cst_105 {dimension_numbers = #tpu.dot_dimension_numbers<[1], [0], [0], [1], [0, 0, 1, 1], [], []>} : vector<8x128xf32>, vector<128x128xf32>, vector<8x128xf32> -> vector<8x128xf32>
    %127 = arith.addf %120, %126 : vector<8x128xf32>
    %c2_106 = arith.constant 2 : index
    %c0_107 = arith.constant 0 : index
    %c0_108 = arith.constant 0 : index
    %128 = vector.load %arg19[%c2_106, %c0_107, %c0_108] : memref<3x8x8xf32, #tpu.memory_space<vmem>>, vector<1x8x8xf32>
    %129 = vector.shape_cast %128 : vector<1x8x8xf32> to vector<8x8xf32>
    %cst_109 = arith.constant dense<0.000000e+00> : vector<8x128xf32>
    %130 = tpu.matmul %129, %106, %cst_109 {dimension_numbers = #tpu.dot_dimension_numbers<[1], [0], [0], [1], [0, 0, 1, 1], [], []>} : vector<8x8xf32>, vector<8x128xf32>, vector<8x128xf32> -> vector<8x128xf32>
    %c2_110 = arith.constant 2 : index
    %c0_111 = arith.constant 0 : index
    %c0_112 = arith.constant 0 : index
    %131 = vector.load %arg21[%c2_110, %c0_111, %c0_112] : memref<3x128x128xf32, #tpu.memory_space<vmem>>, vector<1x128x128xf32>
    %132 = vector.shape_cast %131 : vector<1x128x128xf32> to vector<128x128xf32>
    %cst_113 = arith.constant dense<0.000000e+00> : vector<8x128xf32>
    %133 = tpu.matmul %130, %132, %cst_113 {dimension_numbers = #tpu.dot_dimension_numbers<[1], [0], [0], [1], [0, 0, 1, 1], [], []>} : vector<8x128xf32>, vector<128x128xf32>, vector<8x128xf32> -> vector<8x128xf32>
    %134 = arith.addf %127, %133 : vector<8x128xf32>
    %135 = arith.addf %134, %111 : vector<8x128xf32>
    %cst_114 = arith.constant 0.000000e+00 : f32
    %136 = vector.broadcast %cst_114 : f32 to vector<8x128xf32>
    %137 = arith.cmpf oge, %135, %136 : vector<8x128xf32>
    %cst_115 = arith.constant 1.000000e-01 : f32
    %138 = vector.broadcast %cst_115 : f32 to vector<8x128xf32>
    %139 = arith.mulf %138, %135 : vector<8x128xf32>
    %140 = arith.select %137, %135, %139 : vector<8x128xi1>, vector<8x128xf32>
    %c0_116 = arith.constant 0 : index
    %c0_117 = arith.constant 0 : index
    %c0_118 = arith.constant 0 : index
    %141 = vector.load %arg22[%c0_116, %c0_117, %c0_118] : memref<1x8x128xf32, #tpu.memory_space<vmem>>, vector<1x8x128xf32>
    %142 = vector.shape_cast %141 : vector<1x8x128xf32> to vector<8x128xf32>
    %143 = vector.shape_cast %140 : vector<8x128xf32> to vector<1x8x128xf32>
    tpu.vector_store %arg22[%c0_116, %c0_117, %c0_118], %143 {strides = array<i32>} : memref<1x8x128xf32, #tpu.memory_space<vmem>>, vector<1x8x128xf32>,
    return
  }
  func.func @transform_0(%arg0: i32) -> i32 {
    %c0_i32 = arith.constant 0 : i32
    %c0_i32_0 = arith.constant 0 : i32
    return %c0_i32 : i32
  }
  func.func @transform_1(%arg0: i32) -> (i32, i32, i32) {
    %c0_i32 = arith.constant 0 : i32
    %c0_i32_0 = arith.constant 0 : i32
    %c0_i32_1 = arith.constant 0 : i32
    return %arg0, %c0_i32, %c0_i32_0 : i32, i32, i32
  }
  func.func @transform_2(%arg0: i32) -> (i32, i32) {
    %c0_i32 = arith.constant 0 : i32
    %c0_i32_0 = arith.constant 0 : i32
    %c0_i32_1 = arith.constant 0 : i32
    return %c0_i32, %c0_i32_0 : i32, i32
  }
  func.func @transform_3(%arg0: i32) -> (i32, i32) {
    %c0_i32 = arith.constant 0 : i32
    %c0_i32_0 = arith.constant 0 : i32
    %c0_i32_1 = arith.constant 0 : i32
    return %c0_i32, %c0_i32_0 : i32, i32
  }
  func.func @transform_4(%arg0: i32) -> (i32, i32) {
    %c0_i32 = arith.constant 0 : i32
    %c0_i32_0 = arith.constant 0 : i32
    %c0_i32_1 = arith.constant 0 : i32
    return %c0_i32, %c0_i32_0 : i32, i32
  }
  func.func @transform_5(%arg0: i32) -> (i32, i32, i32) {
    %c0_i32 = arith.constant 0 : i32
    %c0_i32_0 = arith.constant 0 : i32
    %c0_i32_1 = arith.constant 0 : i32
    %c0_i32_2 = arith.constant 0 : i32
    return %c0_i32, %c0_i32_0, %c0_i32_1 : i32, i32, i32
  }
  func.func @transform_6(%arg0: i32) -> (i32, i32) {
    %c0_i32 = arith.constant 0 : i32
    %c0_i32_0 = arith.constant 0 : i32
    %c0_i32_1 = arith.constant 0 : i32
    return %c0_i32, %c0_i32_0 : i32, i32
  }
  func.func @transform_7(%arg0: i32) -> (i32, i32) {
    %c0_i32 = arith.constant 0 : i32
    %c0_i32_0 = arith.constant 0 : i32
    %c0_i32_1 = arith.constant 0 : i32
    return %c0_i32, %c0_i32_0 : i32, i32
  }
  func.func @transform_8(%arg0: i32) -> (i32, i32) {
    %c0_i32 = arith.constant 0 : i32
    %c0_i32_0 = arith.constant 0 : i32
    %c0_i32_1 = arith.constant 0 : i32
    return %c0_i32, %c0_i32_0 : i32, i32
  }
  func.func @transform_9(%arg0: i32) -> (i32, i32, i32) {
    %c0_i32 = arith.constant 0 : i32
    %c0_i32_0 = arith.constant 0 : i32
    %c0_i32_1 = arith.constant 0 : i32
    %c0_i32_2 = arith.constant 0 : i32
    return %c0_i32, %c0_i32_0, %c0_i32_1 : i32, i32, i32
  }
  func.func @transform_10(%arg0: i32) -> (i32, i32) {
    %c0_i32 = arith.constant 0 : i32
    %c0_i32_0 = arith.constant 0 : i32
    %c0_i32_1 = arith.constant 0 : i32
    return %c0_i32, %c0_i32_0 : i32, i32
  }
  func.func @transform_11(%arg0: i32) -> (i32, i32, i32) {
    %c0_i32 = arith.constant 0 : i32
    %c0_i32_0 = arith.constant 0 : i32
    %c0_i32_1 = arith.constant 0 : i32
    %c0_i32_2 = arith.constant 0 : i32
    return %c0_i32, %c0_i32_0, %c0_i32_1 : i32, i32, i32
  }
  func.func @transform_12(%arg0: i32) -> (i32, i32) {
    %c0_i32 = arith.constant 0 : i32
    %c0_i32_0 = arith.constant 0 : i32
    %c0_i32_1 = arith.constant 0 : i32
    return %c0_i32, %c0_i32_0 : i32, i32
  }
  func.func @transform_13(%arg0: i32) -> (i32, i32) {
    %c0_i32 = arith.constant 0 : i32
    %c0_i32_0 = arith.constant 0 : i32
    %c0_i32_1 = arith.constant 0 : i32
    return %c0_i32, %c0_i32_0 : i32, i32
  }
  func.func @transform_14(%arg0: i32) -> (i32, i32) {
    %c0_i32 = arith.constant 0 : i32
    %c0_i32_0 = arith.constant 0 : i32
    %c0_i32_1 = arith.constant 0 : i32
    return %c0_i32, %c0_i32_0 : i32, i32
  }
  func.func @transform_15(%arg0: i32) -> (i32, i32) {
    %c0_i32 = arith.constant 0 : i32
    %c0_i32_0 = arith.constant 0 : i32
    %c0_i32_1 = arith.constant 0 : i32
    return %c0_i32, %c0_i32_0 : i32, i32
  }
  func.func @transform_16(%arg0: i32) -> (i32, i32) {
    %c0_i32 = arith.constant 0 : i32
    %c0_i32_0 = arith.constant 0 : i32
    %c0_i32_1 = arith.constant 0 : i32
    return %c0_i32, %c0_i32_0 : i32, i32
  }
  func.func @transform_17(%arg0: i32) -> (i32, i32) {
    %c0_i32 = arith.constant 0 : i32
    %c0_i32_0 = arith.constant 0 : i32
    %c0_i32_1 = arith.constant 0 : i32
    return %c0_i32, %c0_i32_0 : i32, i32
  }
  func.func @transform_18(%arg0: i32) -> (i32, i32, i32) {
    %c0_i32 = arith.constant 0 : i32
    %c0_i32_0 = arith.constant 0 : i32
    %c0_i32_1 = arith.constant 0 : i32
    %c0_i32_2 = arith.constant 0 : i32
    return %c0_i32, %c0_i32_0, %c0_i32_1 : i32, i32, i32
  }
  func.func @transform_19(%arg0: i32) -> (i32, i32) {
    %c0_i32 = arith.constant 0 : i32
    %c0_i32_0 = arith.constant 0 : i32
    %c0_i32_1 = arith.constant 0 : i32
    return %c0_i32, %c0_i32_0 : i32, i32
  }
  func.func @transform_20(%arg0: i32) -> (i32, i32, i32) {
    %c0_i32 = arith.constant 0 : i32
    %c0_i32_0 = arith.constant 0 : i32
    %c0_i32_1 = arith.constant 0 : i32
    %c0_i32_2 = arith.constant 0 : i32
    return %c0_i32, %c0_i32_0, %c0_i32_1 : i32, i32, i32
  }
  func.func @transform_21(%arg0: i32) -> (i32, i32, i32) {
    %c0_i32 = arith.constant 0 : i32
    %c0_i32_0 = arith.constant 0 : i32
    %c0_i32_1 = arith.constant 0 : i32
    return %arg0, %c0_i32, %c0_i32_0 : i32, i32, i32
  }
}

</mosaic_0001>

<bundles_post_ra>
// kernel: tpu_custom_call.1
= control target key start
LH: loop header
LB: loop body
LE: loop exit
PB: predicated region body
PF: predicated region fallthrough
CT: control target
= control target key end

     0   :  { %s7591_s0 = inlined_call_operand.vmem [shape: f32[2], index: 0, kind: input, shape index: {}]   ;;  %s7592_s1 = inlined_call_operand.hbm [shape: f32[2,4,128], index: 1, kind: input, shape index: {}]   ;;  %s7593_s2 = inlined_call_operand.hbm [shape: f32[4,128], index: 2, kind: input, shape index: {}]   ;;  %s7594_s3 = inlined_call_operand.vmem [shape: f32[16,4], index: 3, kind: input, shape index: {}]   ;;  %s7595_s4 = inlined_call_operand.vmem [shape: f32[16,1], index: 4, kind: input, shape index: {}]   ;;  %s7596_s5 = inlined_call_operand.hbm [shape: f32[2,16,16], index: 5, kind: input, shape index: {}]   ;;  %s7597_s6 = inlined_call_operand.hbm [shape: f32[16,128], index: 6, kind: input, shape index: {}]   ;;  %s7598_s7 = inlined_call_operand.vmem [shape: f32[128,16], index: 7, kind: input, shape index: {}]   ;;  %s7599_s8 = inlined_call_operand.hbm [shape: f32[128,128], index: 8, kind: input, shape index: {}]   ;;  %s7600_s9 = inlined_call_operand.vmem [shape: f32[6,8,4], index: 9, kind: input, shape index: {}]   ;;  %s7601_s10 = inlined_call_operand.vmem [shape: f32[8,1], index: 10, kind: input, shape index: {}]   ;;  %s7602_s11 = inlined_call_operand.hbm [shape: f32[3,128,128], index: 11, kind: input, shape index: {}]   ;;  %s7603_s12 = inlined_call_operand.vmem [shape: f32[8,4], index: 12, kind: input, shape index: {}]   ;;  %s7604_s13 = inlined_call_operand.vmem [shape: f32[8,1], index: 13, kind: input, shape index: {}]   ;;  %s7605_s14 = inlined_call_operand.hbm [shape: f32[8,8], index: 14, kind: input, shape index: {}]   ;;  %s7606_s15 = inlined_call_operand.vmem [shape: f32[8,1], index: 15, kind: input, shape index: {}]   ;;  %s7607_s16 = inlined_call_operand.hbm [shape: f32[8,8], index: 16, kind: input, shape index: {}]   ;;  %s7608_s17 = inlined_call_operand.vmem [shape: f32[8,1], index: 17, kind: input, shape index: {}]   ;;  %s7609_s18 = inlined_call_operand.hbm [shape: f32[3,8,8], index: 18, kind: input, shape index: {}]   ;;  %s7610_s19 = inlined_call_operand.vmem [shape: f32[8,1], index: 19, kind: input, shape index: {}]   ;;  %s7611_s20 = inlined_call_operand.vmem [shape: f32[3,128,128], index: 20, kind: input, shape index: {}]   ;;  %s7612_s21 = inlined_call_operand.hbm [shape: f32[2,8,128], index: 21, kind: output, shape index: {}]  }
   0x1   :  { %7633 = sst [smem:[#allocation30_spill]] %s7591_s0 }
   0x2   :  { %7634 = sst [smem:[#allocation31_spill]] %s7592_s1 }
   0x3   :  { %7635 = sst [smem:[#allocation32_spill]] %s7593_s2 }
   0x4   :  { %7636 = sst [smem:[#allocation33_spill]] %s7594_s3 }
   0x5   :  { %7637 = sst [smem:[#allocation34_spill]] %s7595_s4 }
   0x6   :  { %7638 = sst [smem:[#allocation35_spill]] %s7596_s5 }
   0x7   :  { %7639 = sst [smem:[#allocation36_spill]] %s7597_s6 }
   0x8   :  { %7640 = sst [smem:[#allocation37_spill]] %s7598_s7 }
   0x9   :  { %7641 = sst [smem:[#allocation38_spill]] %s7599_s8 }
   0xa   :  { %7642 = sst [smem:[#allocation39_spill]] %s7600_s9 }
   0xb   :  { %7643 = sst [smem:[#allocation40_spill]] %s7602_s11 }
   0xc   :  { %7644 = sst [smem:[#allocation41_spill]] %s7603_s12 }
   0xd   :  { %7645 = sst [smem:[#allocation42_spill]] %s7606_s15 }
   0xe   :  { %7646 = sst [smem:[#allocation43_spill]] %s7608_s17 }
   0xf   :  { %7647 = sst [smem:[#allocation44_spill]] %s7610_s19 }
  0x10   :  { %7648 = sst [smem:[#allocation45_spill]] %s7611_s20 }
  0x11   :  { %7649 = sst [smem:[#allocation46_spill]] %s7612_s21 }
  0x12   :  { %26 = vsyncpa [#allocation5], 0 }
  0x13   :  { %27 = vsyncpa [#allocation3], 0 }
  0x14   :  { %29 = vsyncpa [#allocation3 + $0x1], 0 }
  0x15   :  { %30 = vsyncpa [#allocation8], 0 }
  0x16   :  { %31 = vsyncpa [#allocation11], 0 }
  0x17   :  { %32 = vsyncpa [#allocation14], 0 }
  0x18   :  { %33 = vsyncpa [#allocation17], 0 }
  0x19   :  { %34 = vsyncpa [#allocation4], 0 }
  0x1a   :  { %36 = vsyncpa [#allocation4 + $0x1], 0  ;;  %s6456_s2 = smov 0   ;;  %s6458_s25 = smov 0  }
  0x1b   :  { %s6460_s26 = smov 0   ;;  %s6462_s27 = smov 0  }
  0x1c LB: > { %s6329_s3 = smov [#allocation7]   ;;  %s6477_s29 = sadd.s32 4294967295, %s6327_s27   ;;  %s6327_s27 = sphi %s6462_s27, %s7699_s27   ;;  %s6323_s26 = sphi %s6460_s26, %s7698_s26   ;;  %s6319_s25 = sphi %s6458_s25, %s7697_s25   ;;  %s6315_s2 = sphi %s6456_s2, %s7696_s2  }
  0x1d   : > { %s543_s28 = sshll.u32 %s6329_s3, 4  ;;  %p4293_p0 = scmp.ge.s32.totalorder %s6327_s27, 1  ;;  %s544_s28 = int_to_ptr.vmem [resolvable:$true] %s543_s28 }
  0x1e   : > { %p7621_p1 = scmp.eq.s32.totalorder %s6477_s29, 0  ;;  %p519_p2 = scmp.lt.s32.totalorder %s6327_s27, 3 }
  0x1f   : > { %s6330_s4 = smov [#allocation10]   ;;  %s6331_s22 = smov [#allocation13]  }
  0x20   : > { %p6482_p3 = pnand %p4293_p0, %p519_p2  ;;  %s572_s30 = sshll.u32 %s6330_s4, 4  ;;  %s6495_s30 = int_to_ptr.vmem [resolvable:$true] %s572_s30 }
  0x21   : > { %s607_s23 = sshll.u32 %s6331_s22, 4  ;;  %s7652_s3 = sld [smem:[#allocation32_spill]]  ;;  %s6497_s23 = int_to_ptr.vmem [resolvable:$true] %s607_s23 }
  0x22   : > { %s7650_s0 = scalar_select %p6482_p3, 1, 0 }
  0x23   : > { %p5859_p5 = pneg %p6482_p3 }
  0x25   : > { %p6491_p6 = pnand %p5859_p5, %p7621_p1 }
  0x27   : > { %s5972_s21 = scalar_lea.hbm %s7652_s3, 64  ;;  %p6507_p8 = pneg %p6491_p6 }
  0x28   : > { %p5973_p7 = scmp.ne.s32.totalorder %s7652_s3, %s5972_s21  ;;  %p5979_p11 = scmp.lt.u32.totalorder %s5972_s21, %s7652_s3 }
  0x2a   : > { %p5975_p9 = pnand %p6507_p8, %p5973_p7 }
  0x2c   : > { %p5976_p10 = pneg %p5975_p9 }
  0x2e   : > { %p5981_p12 = pnand %p5979_p11, %p5976_p10 }
  0x30   : > { %5984 = shalt.err (!%p5981_p12)
}
  0x31   : > { %s5985_s1 = scalar_lea.vmem %s544_s28, 64  ;;  %p5993_p5 = scmp.lt.s32.totalorder %s544_s28, %s544_s28 }
  0x32   : > { %p5986_p13 = scmp.ne.s32.totalorder %s544_s28, %s5985_s1  ;;  %p5994_p4 = scmp.lt.s32.totalorder %s5985_s1, %s5985_s1 }
  0x34   : > { %p5988_p0 = pnand %p5986_p13, %p6507_p8  ;;  %p5995_p1 = por %p5994_p4, %p5993_p5 }
  0x36   : > { %p5989_p2 = pneg %p5988_p0 }
  0x38   : > { %p5996_p3 = pnand %p5995_p1, %p5989_p2 }
  0x3a   : > { %5999 = shalt.err (!%p5996_p3)
}
  0x3b   : > { %5865 = dma.hbm_to_vmem [thread:$0]  (!%p6491_p6), %s7652_s3, 64, %s544_s28, [#allocation8]  }
  0x3c   : > { %s7654_s6 = sld [smem:[#allocation36_spill]] }
  0x42   : > { %s6000_s24 = scalar_lea.hbm %s7654_s6, 256 }
  0x43   : > { %p6001_p7 = scmp.ne.s32.totalorder %s7654_s6, %s6000_s24  ;;  %p6007_p1 = scmp.lt.u32.totalorder %s6000_s24, %s7654_s6 }
  0x45   : > { %p6003_p9 = pnand %p6001_p7, %p6507_p8 }
  0x47   : > { %p6004_p4 = pneg %p6003_p9 }
  0x49   : > { %p6009_p3 = pnand %p6007_p1, %p6004_p4 }
  0x4b   : > { %6012 = shalt.err (!%p6009_p3)
}
  0x4c   : > { %s6013_s28 = scalar_lea.vmem %s6495_s30, 256  ;;  %p6021_p13 = scmp.lt.s32.totalorder %s6495_s30, %s6495_s30 }
  0x4d   : > { %p6014_p10 = scmp.ne.s32.totalorder %s6495_s30, %s6013_s28  ;;  %p6022_p0 = scmp.lt.s32.totalorder %s6013_s28, %s6013_s28 }
  0x4f   : > { %p6016_p11 = pnand %p6014_p10, %p6507_p8  ;;  %p6023_p2 = por %p6022_p0, %p6021_p13 }
  0x51   : > { %p6017_p12 = pneg %p6016_p11 }
  0x53   : > { %p6024_p5 = pnand %p6023_p2, %p6017_p12 }
  0x55   : > { %6027 = shalt.err (!%p6024_p5)
}
  0x56   : > { %s6332_s7 = smov 128   ;;  %s6333_s19 = smov 8  }
  0x57   : > { %5871 = dma.hbm_to_vmem [thread:$0]  (!%p6491_p6), %s7654_s6, 256, %s6495_s30, [#allocation11], %s6332_s7, %s6332_s7, %s6333_s19  }
  0x58   : > { %s7655_s11 = sld [smem:[#allocation40_spill]] }
  0x5e   : > { %s6028_s24 = scalar_lea.hbm %s7655_s11, 6144 }
  0x5f   : > { %p6029_p7 = scmp.ne.s32.totalorder %s7655_s11, %s6028_s24  ;;  %p6035_p1 = scmp.lt.u32.totalorder %s6028_s24, %s7655_s11 }
  0x61   : > { %p6031_p9 = pnand %p6029_p7, %p6507_p8 }
  0x63   : > { %p6032_p4 = pneg %p6031_p9 }
  0x65   : > { %p6037_p3 = pnand %p6035_p1, %p6032_p4 }
  0x67   : > { %6040 = shalt.err (!%p6037_p3)
}
  0x68   : > { %s6041_s30 = scalar_lea.vmem %s6497_s23, 6144  ;;  %p6049_p13 = scmp.lt.s32.totalorder %s6497_s23, %s6497_s23 }
  0x69   : > { %p6042_p10 = scmp.ne.s32.totalorder %s6497_s23, %s6041_s30  ;;  %p6050_p0 = scmp.lt.s32.totalorder %s6041_s30, %s6041_s30 }
  0x6b   : > { %p6044_p11 = pnand %p6042_p10, %p6507_p8  ;;  %p6051_p2 = por %p6050_p0, %p6049_p13 }
  0x6d   : > { %p6045_p12 = pneg %p6044_p11 }
  0x6f   : > { %p6052_p5 = pnand %p6051_p2, %p6045_p12 }
  0x71   : > { %6055 = shalt.err (!%p6052_p5)
}
  0x72   : > { %5877 = dma.hbm_to_vmem [thread:$0]  (!%p6491_p6), %s7655_s11, 6144, %s6497_s23, [#allocation14], %s6332_s7, %s6332_s7, %s6333_s19  }
  0x73   : > { %s6334_s20 = smov [#allocation16]   ;;  %s7656_s22 = sld [smem:[#allocation30_spill]] }
  0x74   : > { %s641_s12 = sshll.u32 %s6334_s20, 4  ;;  %s6056_s6 = scalar_lea.hbm %s7607_s16, 128  ;;  %s642_s12 = int_to_ptr.vmem [resolvable:$true] %s641_s12 }
  0x75   : > { %p6057_p7 = scmp.ne.s32.totalorder %s7607_s16, %s6056_s6  ;;  %p6063_p1 = scmp.lt.u32.totalorder %s6056_s6, %s7607_s16 }
  0x77   : > { %p6059_p9 = pnand %p6057_p7, %p6507_p8 }
  0x79   : > { %s532_s1 = sshll.u32 %s7656_s22, 4  ;;  %p6060_p4 = pneg %p6059_p9  ;;  %s533_s1 = int_to_ptr.vmem [resolvable:$true] %s532_s1 }
  0x7b   : > { %p6065_p3 = pnand %p6063_p1, %p6060_p4 }
  0x7d   : > { %6068 = shalt.err (!%p6065_p3)
}
  0x7e   : > { %s6069_s9 = scalar_lea.vmem %s642_s12, 128  ;;  %p6077_p13 = scmp.lt.s32.totalorder %s642_s12, %s642_s12 }
  0x7f   : > { %p6070_p10 = scmp.ne.s32.totalorder %s642_s12, %s6069_s9  ;;  %p6078_p0 = scmp.lt.s32.totalorder %s6069_s9, %s6069_s9 }
  0x81   : > { %p6072_p11 = pnand %p6070_p10, %p6507_p8  ;;  %p6079_p2 = por %p6078_p0, %p6077_p13 }
  0x83   : > { %p6073_p12 = pneg %p6072_p11 }
  0x85   : > { %p6080_p5 = pnand %p6079_p2, %p6073_p12 }
  0x87   : > { %6083 = shalt.err (!%p6080_p5)
}
  0x88   : > { %5883 = dma.hbm_to_vmem [thread:$0]  (!%p6491_p6), %s7607_s16, 128, %s642_s12, [#allocation17]  }
  0x89   : > { %s6084_s6 = scalar_lea.vmem %s533_s1, 16  ;;  %p6092_p1 = scmp.lt.s32.totalorder %s533_s1, %s533_s1 }
  0x8a   : > { %p6085_p7 = scmp.ne.s32.totalorder %s533_s1, %s6084_s6  ;;  %p6093_p3 = scmp.lt.s32.totalorder %s6084_s6, %s6084_s6 }
  0x8c   : > { %p6087_p9 = pnand %p6085_p7, %p6507_p8  ;;  %p6094_p10 = por %p6093_p3, %p6092_p1 }
  0x8e   : > { %p6088_p4 = pneg %p6087_p9 }
  0x90   : > { %p6095_p11 = pnand %p6094_p10, %p6088_p4 }
  0x92   : > { %6098 = shalt.err (!%p6095_p11)
}
  0x93   : > { %s6335_s20 = smov [#allocation2]   ;;  %s6336_s21 = smov [#allocation9]  }
  0x94   : > { %5862 = dma.vmem_to_smem (!%p6491_p6), %s533_s1, 16, %s6335_s20, [#allocation5]  }
  0x95   : > { %s559_s24 = sshll.u32 %s6336_s21, 4  ;;  %s6337_s22 = smov [#allocation12]   ;;  %s560_s24 = int_to_ptr.vmem [resolvable:$true] %s559_s24 }
  0x96   : > { %s588_s12 = sshll.u32 %s6337_s22, 4  ;;  %s7657_s23 = sld [smem:[#allocation35_spill]]  ;;  %s589_s12 = int_to_ptr.vmem [resolvable:$true] %s588_s12 }
  0x9c   : > { %s6099_s3 = scalar_lea.hbm %s7657_s23, 512 }
  0x9d   : > { %p6100_p12 = scmp.ne.s32.totalorder %s7657_s23, %s6099_s3  ;;  %p6106_p2 = scmp.lt.u32.totalorder %s6099_s3, %s7657_s23 }
  0x9f   : > { %p6102_p13 = pnand %p6100_p12, %p6507_p8 }
  0xa1   : > { %p6103_p0 = pneg %p6102_p13 }
  0xa3   : > { %p6108_p5 = pnand %p6106_p2, %p6103_p0 }
  0xa5   : > { %6111 = shalt.err (!%p6108_p5)
}
  0xa6   : > { %s6112_s1 = scalar_lea.vmem %s560_s24, 512  ;;  %p6120_p1 = scmp.lt.s32.totalorder %s560_s24, %s560_s24 }
  0xa7   : > { %p6113_p7 = scmp.ne.s32.totalorder %s560_s24, %s6112_s1  ;;  %p6121_p3 = scmp.lt.s32.totalorder %s6112_s1, %s6112_s1 }
  0xa9   : > { %p6115_p9 = pnand %p6113_p7, %p6507_p8  ;;  %p6122_p10 = por %p6121_p3, %p6120_p1 }
  0xab   : > { %p6116_p4 = pneg %p6115_p9 }
  0xad   : > { %p6123_p11 = pnand %p6122_p10, %p6116_p4 }
  0xaf   : > { %6126 = shalt.err (!%p6123_p11)
}
  0xb0   : > { %5868 = dma.hbm_to_vmem [thread:$0]  (!%p6491_p6), %s7657_s23, 512, %s560_s24, [#allocation8], %s6332_s7, %s6332_s7, %s6333_s19  }
  0xb1   : > { %s7658_s8 = sld [smem:[#allocation38_spill]] }
  0xb7   : > { %s6127_s30 = scalar_lea.hbm %s7658_s8, 2048 }
  0xb8   : > { %p6128_p12 = scmp.ne.s32.totalorder %s7658_s8, %s6127_s30  ;;  %p6134_p2 = scmp.lt.u32.totalorder %s6127_s30, %s7658_s8 }
  0xba   : > { %p6130_p13 = pnand %p6128_p12, %p6507_p8 }
  0xbc   : > { %p6131_p0 = pneg %p6130_p13 }
  0xbe   : > { %p6136_p5 = pnand %p6134_p2, %p6131_p0 }
  0xc0   : > { %6139 = shalt.err (!%p6136_p5)
}
  0xc1   : > { %s6140_s6 = scalar_lea.vmem %s589_s12, 2048  ;;  %p6148_p1 = scmp.lt.s32.totalorder %s589_s12, %s589_s12 }
  0xc2   : > { %p6141_p7 = scmp.ne.s32.totalorder %s589_s12, %s6140_s6  ;;  %p6149_p3 = scmp.lt.s32.totalorder %s6140_s6, %s6140_s6 }
  0xc4   : > { %p6143_p9 = pnand %p6141_p7, %p6507_p8  ;;  %p6150_p10 = por %p6149_p3, %p6148_p1 }
  0xc6   : > { %p6144_p4 = pneg %p6143_p9 }
  0xc8   : > { %p6151_p11 = pnand %p6150_p10, %p6144_p4 }
  0xca   : > { %6154 = shalt.err (!%p6151_p11)
}
  0xcb   : > { %5874 = dma.hbm_to_vmem [thread:$0]  (!%p6491_p6), %s7658_s8, 2048, %s589_s12, [#allocation11], %s6332_s7, %s6332_s7, %s6333_s19  }
  0xcc   : > { %s6338_s20 = smov [#allocation15]   ;;  %s6339_s22 = smov [#allocation18]  }
  0xcd   : > { %s627_s21 = sshll.u32 %s6338_s20, 4  ;;  %s654_s28 = sshll.u32 %s6339_s22, 4  ;;  %s628_s21 = int_to_ptr.vmem [resolvable:$true] %s627_s21  ;;  %s655_s28 = int_to_ptr.vmem [resolvable:$true] %s654_s28 }
  0xce   : > { %s6155_s9 = scalar_lea.hbm %s7605_s14, 128 }
  0xcf   : > { %p6156_p12 = scmp.ne.s32.totalorder %s7605_s14, %s6155_s9  ;;  %p6162_p2 = scmp.lt.u32.totalorder %s6155_s9, %s7605_s14 }
  0xd1   : > { %p6158_p13 = pnand %p6156_p12, %p6507_p8 }
  0xd3   : > { %p6159_p0 = pneg %p6158_p13 }
  0xd5   : > { %p6164_p5 = pnand %p6162_p2, %p6159_p0 }
  0xd7   : > { %6167 = shalt.err (!%p6164_p5)
}
  0xd8   : > { %s6168_s12 = scalar_lea.vmem %s628_s21, 128  ;;  %p6176_p1 = scmp.lt.s32.totalorder %s628_s21, %s628_s21 }
  0xd9   : > { %p6169_p7 = scmp.ne.s32.totalorder %s628_s21, %s6168_s12  ;;  %p6177_p3 = scmp.lt.s32.totalorder %s6168_s12, %s6168_s12 }
  0xdb   : > { %p6171_p9 = pnand %p6169_p7, %p6507_p8  ;;  %p6178_p10 = por %p6177_p3, %p6176_p1 }
  0xdd   : > { %p6172_p4 = pneg %p6171_p9 }
  0xdf   : > { %p6179_p11 = pnand %p6178_p10, %p6172_p4 }
  0xe1   : > { %6182 = shalt.err (!%p6179_p11)
}
  0xe2   : > { %5880 = dma.hbm_to_vmem [thread:$0]  (!%p6491_p6), %s7605_s14, 128, %s628_s21, [#allocation14]  }
  0xe3   : > { %s6183_s3 = scalar_lea.hbm %s7609_s18, 384 }
  0xe4   : > { %p6184_p12 = scmp.ne.s32.totalorder %s7609_s18, %s6183_s3  ;;  %p6190_p2 = scmp.lt.u32.totalorder %s6183_s3, %s7609_s18 }
  0xe6   : > { %p6186_p13 = pnand %p6184_p12, %p6507_p8 }
  0xe8   : > { %p6187_p0 = pneg %p6186_p13 }
  0xea   : > { %p6192_p5 = pnand %p6190_p2, %p6187_p0 }
  0xec   : > { %6195 = shalt.err (!%p6192_p5)
}
  0xed   : > { %s6196_s24 = scalar_lea.vmem %s655_s28, 384  ;;  %p6204_p1 = scmp.lt.s32.totalorder %s655_s28, %s655_s28 }
  0xee   : > { %p6197_p7 = scmp.ne.s32.totalorder %s655_s28, %s6196_s24  ;;  %p6205_p3 = scmp.lt.s32.totalorder %s6196_s24, %s6196_s24 }
  0xf0   : > { %p6199_p9 = pnand %p6197_p7, %p6507_p8  ;;  %p6206_p10 = por %p6205_p3, %p6204_p1 }
  0xf2   : > { %p6200_p4 = pneg %p6199_p9 }
  0xf4   : > { %p6207_p11 = pnand %p6206_p10, %p6200_p4 }
  0xf6   : > { %6210 = shalt.err (!%p6207_p11)
}
  0xf7   : > { %5886 = dma.hbm_to_vmem [thread:$0]  (!%p6491_p6), %s7609_s18, 384, %s655_s28, [#allocation17], %s6332_s7, %s6332_s7, %s6333_s19  }
  0xf8   : > { %s4292_s5 = sadd.s32 4294967294, %s6327_s27   ;;  %s6683_s4 = sadd.s32 1, %s6327_s27  }
  0xf9   : > { %s70_s1 = sadd.s32 1, %s6323_s26  ;;  %s67_s20 = ssub.s32 %s6327_s27, %s6683_s4 }
  0xfa   : > { %p77_p8 = scmp.ne.s32.totalorder %s6323_s26, %s6319_s25  ;;  %p68_p12 = scmp.eq.s32.totalorder %s67_s20, 0 }
  0xfb   : > { %p78_p13 = scmp.eq.s32.totalorder %s6327_s27, 0  ;;  %p83_p0 = scmp.ne.s32.totalorder %s6319_s25, %s6315_s2 }
  0xfc   : > { %p506_p2 = scmp.eq.s32.totalorder %s6477_s29, 1  ;;  %p7659_p7 = scmp.eq.s32.totalorder %s6477_s29, 0 }
  0xfd   : > { %s6695_s22 = scalar_select %p68_p12, %s6323_s26, %s70_s1  }
  0xfe   : > { %p79_p5 = por %p78_p13, %p77_p8  ;;  %p6699_p9 = por %p7659_p7, %p83_p0 }
  0xff   : > { %p6703_p6 = por %p506_p2, %p77_p8  ;;  %p512_p4 = scmp.eq.s32.totalorder %s4292_s5, 1 }
 0x100   : > { %p5904_p1 = scmp.lt.s32.totalorder %s6327_s27, 2  ;;  %s674_s19 = sand.u32 1, %s6323_s26  }
 0x101   : > { %s7661_s7 = scalar_select %p6703_p6, 1, 0 }
 0x102   : > { %p6709_p3 = por %p512_p4, %p83_p0  ;;  %s4304_s3 = sshll.u32 %s674_s19, 2 }
 0x103   : > { %s4305_s9 = sshll.u32 %s6327_s27, 6  ;;  %s7663_s6 = sld [smem:[#allocation31_spill]] }
 0x104   : > { %s7662_s28 = scalar_select %p6709_p3, 1, 0 }
 0x105   : > { %s678_s21 = scalar_lea.vmem [#allocation6], %s4304_s3  ;;  %p6719_p10 = pnand %p5904_p1, %p79_p5 }
 0x106   : > { %s685_s12 = sshll.u32 %s678_s21, 4  ;;  %s675_s1 = scalar_lea.sflag [#allocation3], %s674_s19  ;;  %s6723_s12 = int_to_ptr.vmem [resolvable:$true] %s685_s12 }
 0x107   : > { %p6213_p8 = pneg %p6719_p10 }
 0x109   : > { %s6717_s24 = scalar_lea.hbm %s7663_s6, %s4305_s9  ;;  %s6216_s15 = scalar_lea.hbm %s7663_s6, 128 }
 0x10a   : > { %s6211_s20 = scalar_lea.hbm %s6717_s24, 64  ;;  %p6217_p0 = scmp.lt.u32.totalorder %s6717_s24, %s7663_s6 }
 0x10b   : > { %p6212_p11 = scmp.ne.s32.totalorder %s6717_s24, %s6211_s20  ;;  %p6218_p2 = scmp.lt.u32.totalorder %s6216_s15, %s6211_s20 }
 0x10c   : > { %p6220_p7 = scmp.lt.u32.totalorder %s6211_s20, %s6717_s24 }
 0x10d   : > { %p6214_p12 = pnand %p6213_p8, %p6212_p11  ;;  %p6219_p5 = por %p6218_p2, %p6217_p0 }
 0x10f   : > { %p6215_p13 = pneg %p6214_p12  ;;  %p6221_p4 = por %p6220_p7, %p6219_p5 }
 0x111   : > { %p6222_p1 = pnand %p6221_p4, %p6215_p13 }
 0x113   : > { %6225 = shalt.err (!%p6222_p1)
}
 0x114   : > { %s6226_s19 = scalar_lea.vmem %s6723_s12, 64  ;;  %s6340_s9 = smov [#allocation6]  }
 0x115   : > { %p6227_p11 = scmp.ne.s32.totalorder %s6723_s12, %s6226_s19  ;;  %s6231_s3 = sshll.u32 %s6340_s9, 4  ;;  %s6232_s3 = int_to_ptr.vmem [resolvable:$false] %s6231_s3 }
 0x116   : > { %s6233_s17 = scalar_lea.vmem %s6232_s3, 128  ;;  %p6234_p6 = scmp.lt.s32.totalorder %s6723_s12, %s6232_s3 }
 0x117   : > { %p6229_p12 = pnand %p6227_p11, %p6213_p8  ;;  %p6235_p0 = scmp.lt.s32.totalorder %s6233_s17, %s6226_s19 }
 0x119   : > { %p6230_p3 = pneg %p6229_p12  ;;  %p6236_p2 = por %p6235_p0, %p6234_p6 }
 0x11b   : > { %p6237_p5 = pnand %p6236_p2, %p6230_p3 }
 0x11d   : > { %6240 = shalt.err (!%p6237_p5)
}
 0x11e   : > { %5890 = dma.hbm_to_vmem [thread:$0]  (!%p6719_p10), %s6717_s24, 64, %s6723_s12, %s675_s1  }
 0x11f   : > { %p7665_p13 = scmp.ne.s32.totalorder %s7650_s0, 0 }
 0x121   : > { %694 = sbr.rel (%p7665_p13) target bundleno = 4641 (0x1221), region = 104 }
 0x128   : > { %p7666_p8 = scmp.eq.s32.totalorder %s6477_s29, 0 }
 0x12a   : > { %6286 = dma.done.wait (%p7666_p8), [#allocation5], 16   ;;  %p7667_p7 = pmov %p7666_p8 }
 0x12b   : > { %s6757_s20 = sand.u32 1, %s6319_s25  }
 0x12c   : > { %6288 = vsyncadd (%p7667_p7), [#allocation5], 4294967280  ;;  %s4308_s15 = sshll.u32 %s6757_s20, 2  ;;  %s701_s5 = scalar_lea.sflag [#allocation3], %s6757_s20 }
 0x12d   : > { %s6761_s21 = scalar_lea.vmem [#allocation6], %s4308_s15 }
 0x12e   : > { %6290 = dma.done.wait (%p6699_p9), %s701_s5, 64  }
 0x12f   : > { %6292 = vsyncadd (%p6699_p9), %s701_s5, 4294967232  ;;  %p7668_p6 = pmov %p7667_p7 }
 0x131   : > { %6294 = dma.done.wait (%p7668_p6), [#allocation8], 576   ;;  %p7669_p3 = pmov %p7668_p6 }
 0x133   : > { %6296 = vsyncadd (%p7669_p3), [#allocation8], 4294966720  ;;  %p7670_p10 = pmov %p7669_p3 }
 0x134   : > { %p7671_p4 = pmov %p7669_p3 }
 0x135   : > { %6298 = dma.done.wait (%p7670_p10), [#allocation11], 2304  }
 0x136   : > { %6300 = vsyncadd (%p7671_p4), [#allocation11], 4294964992  ;;  %p7672_p1 = pmov %p7669_p3 }
 0x138   : > { %6302 = dma.done.wait (%p7672_p1), [#allocation14], 6272   ;;  %p7673_p11 = pmov %p7672_p1 }
 0x139   : > { %p7674_p9 = pmov %p7672_p1 }
 0x13a   : > { %6304 = vsyncadd (%p7673_p11), [#allocation14], 4294961024 }
 0x13b   : > { %6306 = dma.done.wait (%p7674_p9), [#allocation17], 512   ;;  %p7675_p12 = pmov %p7672_p1 }
 0x13d   : > { %6308 = vsyncadd (%p7675_p12), [#allocation17], 4294966784 }
 0x13e   : > { %741 = sfence }
 0x13f   : > { %v6784_v0 = vld [vmem:[%s6761_s21] sm:$0xf]  ;;  %v799_v1 = vld [vmem:[#allocation7] sm:$0xf]  ;;  %vm820_vm0 = vcmask 1043456   ;;  %s7676_s24 = sld [smem:[#allocation33_spill]] }
 0x140   : > { %v800_v3 = vadd.f32 %v799_v1, %v6784_v0  ;;  %vm813_vm1 = vcmask 31744   ;;  %s7677_s19 = sld [smem:[#allocation34_spill]]  ;;  %v6341_v6 = vmov 0   ;;  %v2729_v8 = vld [vmem:[%s7601_s10] sm:$0xff]  ;;  %s7679_s6 = sld [smem:[#allocation43_spill]]  ;;  %v6840_v36 = vld [vmem:[#allocation10] sm:$0xff] }
 0x141   : > { %5962 = vset.pattern.permute.xlu0 %v6341_v6  ;;  %v2647_v9 = vld [vmem:[%s7604_s13] sm:$0xff]  ;;  %s7678_s3 = sld [smem:[#allocation42_spill]]  ;;  %s7680_s5 = sld [smem:[#allocation44_spill]]  ;;  %v6849_v44 = vld [vmem:[#allocation12 + $0x18] sm:$0xff]  ;;  %v6851_v45 = vld [vmem:[#allocation12 + $0x10] sm:$0xff]  ;;  %vm1339_vm2 = vcmask 130048  }
 0x142   : > { %4821 = vmatprep.subr.msk.mxu0 %vm820_vm0, %v800_v3  ;;  %v6843_v37 = vld [vmem:[#allocation12 + $0x8] sm:$0xff]  ;;  %v6845_v38 = vld [vmem:[#allocation12] sm:$0xff]  ;;  %v6861_v58 = vld [vmem:[#allocation12 + $0x38] sm:$0xff]  ;;  %vm6343_vm3 = vmmov 0   ;;  %s4387_s8 = sld [smem:[#allocation2 + $0x1]]  ;;  %s7689_s30 = sld [smem:[#allocation41_spill]] }
 0x143   : > { %4822 = vmatpush3.msk.msra.mxu0 %vm820_vm0, %v800_v3  ;;  %v6855_v51 = vld [vmem:[#allocation12 + $0x28] sm:$0xff]  ;;  %v6857_v52 = vld [vmem:[#allocation12 + $0x20] sm:$0xff]  ;;  %v6863_v59 = vld [vmem:[#allocation12 + $0x30] sm:$0xff]  ;;  %s7690_s1 = sld [smem:[#allocation39_spill]]  ;;  %vm3464_vm5 = vcmask 64512   ;;  %s4317_s11 = sshll.u32 %s6757_s20, 3 }
 0x144   : > { %v6869_v3 = vld [vmem:[#allocation12 + $0x40] sm:$0xff]  ;;  %s4477_s0 = sshll.u32 %s6477_s29, 7  ;;  %s7692_s17 = sld [smem:[#allocation46_spill]] }
 0x145   : > { %v797_v2 = vld [vmem:[%s7676_s24] sm:$0xff]  ;;  %v798_v5 = vld [vmem:[%s7676_s24 + $0x8] sm:$0xff]  ;;  %p7693_p2 = scmp.ne.s32.totalorder %s7661_s7, 0  ;;  %s6345_s29 = smov [#allocation19]  }
 0x146   : > { %v801_v4 = vld [vmem:[%s7677_s19] sm:$0xff]  ;;  %4823 = vmatprep.mubr.msk.f32.mxu0 %vm813_vm1, %v797_v2  ;;  %v802_v7 = vld [vmem:[%s7677_s19 + $0x8] sm:$0xff] }
 0x147   : > { %805 = vperm.xlu0 %5962, %v801_v4   ;;  %4824 = vmatmul.mubr.msk.f32.vlgmr.msra.gmra.mrb[0].mxu0 %vm813_vm1, %v798_v5  ;;  %v3458_v10 = vld [vmem:[%s7678_s3] sm:$0xff]  ;;  %s7691_s3 = sld [smem:[#allocation45_spill]] }
 0x148   : > { %v3543_v11 = vld [vmem:[%s7679_s6] sm:$0xff]  ;;  %s7681_s6 = sld [smem:[#allocation37_spill]] }
 0x149   : > { %v3622_v12 = vld [vmem:[%s7680_s5] sm:$0xff]  ;;  %s1331_s5 = sld [smem:[#allocation2]] }
 0x14a   : > { %v6867_v2 = vld [vmem:[#allocation12 + $0x48] sm:$0xff]  ;;  %s7547_s15 = scalar_lea.hbm %s7692_s17, %s4477_s0 }
 0x14b   : > { %810 = vperm.xlu0 %5962, %v802_v7  }
 0x14f   : > { %2973 = vperm.xlu0 %5962, %v2729_v8  }
 0x153   : > { %2650 = vperm.xlu0 %5962, %v2647_v9   ;;  %v6873_v9 = vld [vmem:[#allocation12 + $0x58] sm:$0xff] }
 0x157   : > { %3461 = vperm.xlu0 %5962, %v3458_v10   ;;  %v6875_v10 = vld [vmem:[#allocation12 + $0x50] sm:$0xff] }
 0x15b   : > { %3546 = vperm.xlu0 %5962, %v3543_v11  }
 0x15f   : > { %3785 = vperm.xlu0 %5962, %v3622_v12  }
 0x1c6   : > { %v806_v13 = vpop.permute.xlu0 %805 }
 0x1ca   : > { %v811_v14 = vpop.permute.xlu0 %810 }
 0x21a   : > { %v4825_v15 = vpop.f32.mrb[0].mxu0 }
 0x21b   : > { %v6818_v16 = vadd.f32 %v4825_v15, %v811_v14  ;;  %v890_v17 = vpop.f32.mrb[1].mxu0 }
 0x21c   : > { %v891_v18 = vadd.f32 %v890_v17, %v806_v13  ;;  %v6879_v17 = vld [vmem:[#allocation12 + $0x68] sm:$0xff] }
 0x21d   : > { %4826 = vmatprep.subr.msk.mxu1 %vm820_vm0, %v6818_v16 }
 0x21e   : > { %4827 = vmatpush3.msk.msra.mxu1 %vm820_vm0, %v6818_v16  ;;  %933 = vxpose.xlu1.b32.start.end [1/1] (short) %v891_v18, 128  ;;  %v1813_v19 = vrot.slane %v891_v18, 4  ;;  %v6881_v18 = vld [vmem:[#allocation12 + $0x60] sm:$0xff] }
 0x25b   : > { %1815 = vxpose.xlu1.b32.start.end [1/1] (short) %v1813_v19, 128 }
 0x29e   : > { %v949_v20 = vpop.trf.xlu1 }
 0x29f   : > { %4828 = vmatprep.mubr.msk.f32.mxu1 %vm813_vm1, %v949_v20 }
 0x2a2   : > { %v950_v21 = vpop.trf.xlu1 }
 0x2a3   : > { %4829 = vmatmul.mubr.msk.f32.vlgmr.msra.gmra.mrb[0].mxu1 %vm813_vm1, %v950_v21 }
 0x2a6   : > { %v951_v22 = vpop.trf.xlu1 }
 0x2a7   : > { %4831 = vmatprep.mubr.msk.f32.mxu1 %vm813_vm1, %v951_v22 }
 0x2aa   : > { %v952_v23 = vpop.trf.xlu1 }
 0x2ab   : > { %4832 = vmatmul.mubr.msk.f32.gmra.mrb[2].mxu1 %vm813_vm1, %v952_v23 }
 0x2ae   : > { %v953_v24 = vpop.trf.xlu1 }
 0x2af   : > { %4834 = vmatprep.mubr.msk.f32.mxu1 %vm813_vm1, %v953_v24  ;;  %v6885_v24 = vld [vmem:[#allocation12 + $0x78] sm:$0xff] }
 0x2b2   : > { %v954_v25 = vpop.trf.xlu1 }
 0x2b3   : > { %4835 = vmatmul.mubr.msk.f32.gmra.mrb[4].mxu1 %vm813_vm1, %v954_v25  ;;  %v6887_v25 = vld [vmem:[#allocation12 + $0x70] sm:$0xff] }
 0x2b6   : > { %v955_v26 = vpop.trf.xlu1 }
 0x2b7   : > { %4837 = vmatprep.mubr.msk.f32.mxu1 %vm813_vm1, %v955_v26 }
 0x2ba   : > { %v956_v27 = vpop.trf.xlu1 }
 0x2bb   : > { %4838 = vmatmul.mubr.msk.f32.gmra.mrb[6].mxu1 %vm813_vm1, %v956_v27 }
 0x2be   : > { %v957_v28 = vpop.trf.xlu1 }
 0x2bf   : > { %4840 = vmatprep.mubr.msk.f32.mxu1 %vm813_vm1, %v957_v28 }
 0x2c2   : > { %v958_v29 = vpop.trf.xlu1 }
 0x2c3   : > { %4841 = vmatmul.mubr.msk.f32.gmra.mrb[8].mxu1 %vm813_vm1, %v958_v29  ;;  %v6893_v29 = vld [vmem:[%s7681_s6] sm:$0xff] }
 0x2c4   : > { %4926 = vmatprep.mubr.msk.f32.mxu0 %vm1339_vm2, %v6893_v29 }
 0x2c6   : > { %v959_v30 = vpop.trf.xlu1 }
 0x2c7   : > { %4843 = vmatprep.mubr.msk.f32.mxu1 %vm813_vm1, %v959_v30  ;;  %v6898_v30 = vld [vmem:[%s7681_s6 + $0x8] sm:$0xff] }
 0x2ca   : > { %v960_v31 = vpop.trf.xlu1 }
 0x2cb   : > { %4844 = vmatmul.mubr.msk.f32.gmra.mrb[10].mxu1 %vm813_vm1, %v960_v31 }
 0x2ce   : > { %v961_v32 = vpop.trf.xlu1 }
 0x2cf   : > { %4846 = vmatprep.mubr.msk.f32.mxu1 %vm813_vm1, %v961_v32 }
 0x2d2   : > { %v962_v33 = vpop.trf.xlu1 }
 0x2d3   : > { %4847 = vmatmul.mubr.msk.f32.gmra.mrb[12].mxu1 %vm813_vm1, %v962_v33  ;;  %v6903_v33 = vpack.c.bf16 %v6898_v30, %v6893_v29 }
 0x2d6   : > { %v963_v34 = vpop.trf.xlu1 }
 0x2d7   : > { %4849 = vmatprep.mubr.msk.f32.mxu1 %vm813_vm1, %v963_v34  ;;  %v6908_v34 = vld [vmem:[%s7681_s6 + $0x10] sm:$0xff] }
 0x2da   : > { %v964_v35 = vpop.trf.xlu1 }
 0x2db   : > { %4850 = vmatmul.mubr.msk.f32.gmra.mrb[14].mxu1 %vm813_vm1, %v964_v35  ;;  %v6913_v35 = vld [vmem:[%s7681_s6 + $0x18] sm:$0xff] }
 0x2dc   : > { %4884 = vmatprep.mubr.f32.mxu1 %v6840_v36 }
 0x376   : > { %v4830_v39 = vpop.f32.mrb[0].mxu1 }
 0x377   : > { %v1162_v40 = vmul.f32 %v4830_v39, %v6843_v37  ;;  %v1082_v41 = vpop.f32.mrb[1].mxu1  ;;  %v6915_v39 = vld [vmem:[#allocation10 + $0x8] sm:$0xff] }
 0x378   : > { %v1161_v42 = vmul.f32 %v1082_v41, %v6845_v38  ;;  %v6925_v41 = vld [vmem:[%s7681_s6 + $0x20] sm:$0xff] }
 0x37a   : > { %v5470_v43 = vpack.c.bf16 %v1162_v40, %v1161_v42  ;;  %v6920_v40 = vpack.c.bf16 %v6913_v35, %v6908_v34  ;;  %v6930_v42 = vld [vmem:[%s7681_s6 + $0x28] sm:$0xff] }
 0x37c   : > { %5471 = vmatprep.subr.bf16.mxu1 %v5470_v43 }
 0x37d   : > { %5473 = vmatpush3.bf16.msra.mxu1 %v5470_v43  ;;  %v6937_v43 = vpack.c.bf16 %v6930_v42, %v6925_v41 }
 0x37e   : > { %v4833_v46 = vpop.f32.mrb[2].mxu1 }
 0x37f   : > { %v1164_v47 = vmul.f32 %v4833_v46, %v6849_v44  ;;  %v1092_v48 = vpop.f32.mrb[3].mxu1  ;;  %v6942_v46 = vld [vmem:[%s7681_s6 + $0x30] sm:$0xff] }
 0x380   : > { %v1163_v49 = vmul.f32 %v1092_v48, %v6851_v45 }
 0x382   : > { %v5474_v50 = vpack.c.bf16 %v1164_v47, %v1163_v49  ;;  %v6947_v47 = vld [vmem:[%s7681_s6 + $0x38] sm:$0xff]  ;;  %v6958_v49 = vld [vmem:[%s7681_s6 + $0x40] sm:$0xff] }
 0x383   : > { %v6953_v48 = vpack.c.bf16 %v6947_v47, %v6942_v46 }
 0x384   : > { %5475 = vmatprep.subr.bf16.mxu1 %v5474_v50 }
 0x385   : > { %5477 = vmatpush3.bf16.msra.mxu1 %v5474_v50  ;;  %v6963_v50 = vld [vmem:[%s7681_s6 + $0x48] sm:$0xff] }
 0x386   : > { %v4836_v53 = vpop.f32.mrb[4].mxu1 }
 0x387   : > { %v1166_v54 = vmul.f32 %v4836_v53, %v6855_v51  ;;  %v1102_v55 = vpop.f32.mrb[5].mxu1  ;;  %v6969_v53 = vpack.c.bf16 %v6963_v50, %v6958_v49 }
 0x388   : > { %v1165_v56 = vmul.f32 %v1102_v55, %v6857_v52  ;;  %v6979_v55 = vld [vmem:[%s7681_s6 + $0x58] sm:$0xff] }
 0x38a   : > { %v5478_v57 = vpack.c.bf16 %v1166_v54, %v1165_v56  ;;  %v6974_v54 = vld [vmem:[%s7681_s6 + $0x50] sm:$0xff] }
 0x38b   : > { %v6985_v56 = vpack.c.bf16 %v6979_v55, %v6974_v54 }
 0x38c   : > { %5479 = vmatprep.subr.bf16.mxu1 %v5478_v57 }
 0x38d   : > { %5481 = vmatpush3.bf16.msra.mxu1 %v5478_v57  ;;  %v6990_v57 = vld [vmem:[%s7681_s6 + $0x60] sm:$0xff] }
 0x38e   : > { %v4839_v60 = vpop.f32.mrb[6].mxu1 }
 0x38f   : > { %v1168_v61 = vmul.f32 %v4839_v60, %v6861_v58  ;;  %v1112_v62 = vpop.f32.mrb[7].mxu1  ;;  %v6995_v60 = vld [vmem:[%s7681_s6 + $0x68] sm:$0xff] }
 0x390   : > { %v1167_v63 = vmul.f32 %v1112_v62, %v6863_v59  ;;  %7682 = vst [vmem:[#allocation27_spill] sm:$0xff] %v6995_v60  ;;  %v7006_v62 = vld [vmem:[%s7681_s6 + $0x70] sm:$0xff] }
 0x391   : > { %7683 = vst [vmem:[#allocation28_spill] sm:$0xff] %v7006_v62 }
 0x392   : > { %v5482_v1 = vpack.c.bf16 %v1168_v61, %v1167_v63  ;;  %v7001_v61 = vpack.c.bf16 %v6995_v60, %v6990_v57  ;;  %v7011_v63 = vld [vmem:[%s7681_s6 + $0x78] sm:$0xff] }
 0x393   : > { %7684 = vst [vmem:[#allocation29_spill] sm:$0xff] %v7011_v63 }
 0x394   : > { %5483 = vmatprep.subr.bf16.mxu1 %v5482_v1 }
 0x395   : > { %5485 = vmatpush3.bf16.msra.mxu1 %v5482_v1  ;;  %v7017_v1 = vpack.c.bf16 %v7011_v63, %v7006_v62 }
 0x396   : > { %v4842_v4 = vpop.f32.mrb[8].mxu1 }
 0x397   : > { %v1170_v5 = vmul.f32 %v4842_v4, %v6867_v2  ;;  %v1122_v6 = vpop.f32.mrb[9].mxu1  ;;  %v7022_v4 = vpack.c.bf16 %v6915_v39, %v6840_v36 }
 0x398   : > { %v1169_v7 = vmul.f32 %v1122_v6, %v6869_v3 }
 0x39a   : > { %v5486_v8 = vpack.c.bf16 %v1170_v5, %v1169_v7 }
 0x39c   : > { %5487 = vmatprep.subr.bf16.mxu1 %v5486_v8 }
 0x39d   : > { %5489 = vmatpush3.bf16.msra.mxu1 %v5486_v8 }
 0x39e   : > { %v4845_v11 = vpop.f32.mrb[10].mxu1 }
 0x39f   : > { %v1172_v12 = vmul.f32 %v4845_v11, %v6873_v9  ;;  %v1132_v13 = vpop.f32.mrb[11].mxu1 }
 0x3a0   : > { %v1171_v14 = vmul.f32 %v1132_v13, %v6875_v10  ;;  %v1332_v13 = vstv %s1331_s5  ;;  %s4121_s5 = scalar_lea.sflag [#allocation4], %s6757_s20 }
 0x3a2   : > { %v5490_v15 = vpack.c.bf16 %v1172_v12, %v1171_v14 }
 0x3a4   : > { %5491 = vmatprep.subr.bf16.mxu1 %v5490_v15 }
 0x3a5   : > { %5493 = vmatpush3.bf16.msra.mxu1 %v5490_v15  ;;  %v1336_v15 = vld [vmem:[#allocation9 + $0x8] sm:$0xff] }
 0x3a6   : > { %v4848_v19 = vpop.f32.mrb[12].mxu1 }
 0x3a7   : > { %v1174_v20 = vmul.f32 %v4848_v19, %v6879_v17  ;;  %v1142_v21 = vpop.f32.mrb[13].mxu1 }
 0x3a8   : > { %v1173_v22 = vmul.f32 %v1142_v21, %v6881_v18  ;;  %v1335_v21 = vld [vmem:[#allocation9] sm:$0xff] }
 0x3aa   : > { %v5494_v23 = vpack.c.bf16 %v1174_v20, %v1173_v22 }
 0x3ac   : > { %5495 = vmatprep.subr.bf16.mxu1 %v5494_v23 }
 0x3ad   : > { %5497 = vmatpush3.bf16.msra.mxu1 %v5494_v23 }
 0x3ae   : > { %v4851_v26 = vpop.f32.mrb[14].mxu1 }
 0x3af   : > { %v1176_v27 = vmul.f32 %v4851_v26, %v6885_v24  ;;  %v1152_v28 = vpop.f32.mrb[15].mxu1 }
 0x3b0   : > { %v1175_v31 = vmul.f32 %v1152_v28, %v6887_v25 }
 0x3b2   : > { %v5498_v32 = vpack.c.bf16 %v1176_v27, %v1175_v31 }
 0x3b4   : > { %5499 = vmatprep.subr.bf16.mxu1 %v5498_v32 }
 0x3b5   : > { %5501 = vmatpush3.bf16.msra.mxu1 %v5498_v32 }
 0x3b6   : > { %5503 = vmatprep.subr.bf16.mxu1 %v6903_v33 }
 0x3b8   : > { %4885 = vmatmul.mubr.f32.vlgmr.msra.gmra.mrb[16].mxu1 %v6915_v39 }
 0x3b9   : > { %5505 = vmatpush3.bf16.msra.mxu1 %v6903_v33 }
 0x3ba   : > { %5507 = vmatprep.subr.bf16.mxu1 %v6920_v40 }
 0x3bd   : > { %5509 = vmatpush3.bf16.msra.mxu1 %v6920_v40 }
 0x3be   : > { %5511 = vmatprep.subr.bf16.mxu1 %v6937_v43 }
 0x3c1   : > { %5513 = vmatpush3.bf16.msra.mxu1 %v6937_v43 }
 0x3c2   : > { %5515 = vmatprep.subr.bf16.mxu1 %v6953_v48 }
 0x3c5   : > { %5517 = vmatpush3.bf16.msra.mxu1 %v6953_v48 }
 0x3c6   : > { %5519 = vmatprep.subr.bf16.mxu1 %v6969_v53 }
 0x3c9   : > { %5521 = vmatpush3.bf16.msra.mxu1 %v6969_v53 }
 0x3ca   : > { %5523 = vmatprep.subr.bf16.mxu1 %v6985_v56 }
 0x3cd   : > { %5525 = vmatpush3.bf16.msra.mxu1 %v6985_v56 }
 0x3ce   : > { %5527 = vmatprep.subr.bf16.mxu1 %v7001_v61 }
 0x3d1   : > { %5529 = vmatpush3.bf16.msra.mxu1 %v7001_v61 }
 0x3d2   : > { %5531 = vmatprep.subr.bf16.mxu1 %v7017_v1 }
 0x3d5   : > { %5533 = vmatpush3.bf16.msra.mxu1 %v7017_v1 }
 0x3d6   : > { %5539 = vmatprep.subr.bf16.mxu1 %v7022_v4 }
 0x48b   : > { %v4886_v5 = vpop.f32.mrb[16].mxu1 }
 0x48c   : > { %v1243_v6 = vpop.f32.mrb[17].mxu1 }
 0x48d   : > { %4919 = vmatprep.mubr.f32.mxu1 %v1243_v6 }
 0x48e   : > { %4920 = vmatmul.mubr.f32.vlgmr.msra.gmra.mrb[18].mxu1 %v4886_v5 }
 0x48f   : > { %5541 = vmatpush3.bf16.msra.mxu1 %v7022_v4 }
 0x561   : > { %v4921_v7 = vpop.f32.mrb[18].mxu1 }
 0x562   : > { %v1328_v8 = vmul.f32 0.03125, %v4921_v7  ;;  %v1318_v11 = vpop.f32.mrb[19].mxu1 }
 0x563   : > { %v1327_v12 = vmul.f32 0.03125, %v1318_v11 }
 0x564   : > { %5963 = vtanh.f32 %v1328_v8 }
 0x565   : > { %5965 = vtanh.f32 %v1327_v12 }
 0x56e   : > { %v5964_v14 = vpop.eup %5963 }
 0x56f   : > { %v5966_v19 = vpop.eup %5965  ;;  %v1334_v20 = vmul.f32 %v5964_v14, %v1332_v13 }
 0x570   : > { %v1333_v22 = vmul.f32 %v5966_v19, %v1332_v13 }
 0x571   : > { %v1338_v23 = vadd.f32 %v1336_v15, %v1334_v20 }
 0x572   : > { %v1337_v26 = vadd.f32 %v1335_v21, %v1333_v22  ;;  %v6342_v22 = vmov 0.0|0.0  }
 0x573   : > { %5542 = vmatprep.subr.bf16.mxu1 %v6342_v22 }
 0x574   : > { %v5534_v27 = vpack.c.bf16 %v1338_v23, %v1337_v26  ;;  %v7627_v23 = vmov 0.0   ;;  %v7080_v26 = vpop.trf.xlu1 }
 0x576   : > { %5535 = vmatprep.subr.bf16.mxu0 %v5534_v27 }
 0x577   : > { %5537 = vmatpush3.bf16.msra.mxu0 %v5534_v27 }
 0x578   : > { %v7082_v27 = vpop.trf.xlu1 }
 0x57a   : > { %4927 = vmatmul.mubr.msk.f32.vlgmr.msra.gmra.mrb[2].mxu0 %vm1339_vm2, %v6898_v30 }
 0x57b   : > { %4929 = vmatprep.mubr.msk.f32.mxu0 %vm1339_vm2, %v6908_v34 }
 0x57e   : > { %4930 = vmatmul.mubr.msk.f32.gmra.mrb[4].mxu0 %vm1339_vm2, %v6913_v35 }
 0x57f   : > { %4932 = vmatprep.mubr.msk.f32.mxu0 %vm1339_vm2, %v6925_v41 }
 0x582   : > { %4933 = vmatmul.mubr.msk.f32.gmra.mrb[6].mxu0 %vm1339_vm2, %v6930_v42 }
 0x583   : > { %4935 = vmatprep.mubr.msk.f32.mxu0 %vm1339_vm2, %v6942_v46 }
 0x586   : > { %4936 = vmatmul.mubr.msk.f32.gmra.mrb[8].mxu0 %vm1339_vm2, %v6947_v47 }
 0x587   : > { %4938 = vmatprep.mubr.msk.f32.mxu0 %vm1339_vm2, %v6958_v49 }
 0x58a   : > { %4939 = vmatmul.mubr.msk.f32.gmra.mrb[10].mxu0 %vm1339_vm2, %v6963_v50 }
 0x58b   : > { %4941 = vmatprep.mubr.msk.f32.mxu0 %vm1339_vm2, %v6974_v54 }
 0x58e   : > { %4942 = vmatmul.mubr.msk.f32.gmra.mrb[12].mxu0 %vm1339_vm2, %v6979_v55 }
 0x58f   : > { %4944 = vmatprep.mubr.msk.f32.mxu0 %vm1339_vm2, %v6990_v57 }
 0x592   : > { %4945 = vmatmul.mubr.msk.f32.gmra.mrb[14].mxu0 %vm1339_vm2, %v6995_v60 }
 0x593   : > { %4947 = vmatprep.mubr.msk.f32.mxu0 %vm1339_vm2, %v7006_v62 }
 0x596   : > { %4948 = vmatmul.mubr.msk.f32.gmra.mrb[16].mxu0 %vm1339_vm2, %v7011_v63 }
 0x597   : > { %5071 = vmatprep.mubr.f32.mxu0 %v6840_v36 }
 0x64d   : > { %v4928_v28 = vpop.f32.mrb[2].mxu0 }
 0x64e   : > { %v1454_v31 = vpop.f32.mrb[3].mxu0 }
 0x64f   : > { %4954 = vmatprep.mubr.msk.f32.mxu1 %vm1339_vm2, %v1454_v31 }
 0x650   : > { %4955 = vmatmul.mubr.msk.f32.vlgmr.msra.gmra.mrb[20].mxu1 %vm1339_vm2, %v4928_v28  ;;  %v7084_v28 = vpop.trf.xlu1 }
 0x651   : > { %v4931_v32 = vpop.f32.mrb[4].mxu0 }
 0x652   : > { %v1464_v5 = vpop.f32.mrb[5].mxu0 }
 0x653   : > { %4957 = vmatprep.mubr.msk.f32.mxu1 %vm1339_vm2, %v1464_v5 }
 0x654   : > { %4958 = vmatmul.mubr.msk.f32.gmra.mrb[22].mxu1 %vm1339_vm2, %v4931_v32  ;;  %v7086_v31 = vpop.trf.xlu1 }
 0x655   : > { %v4934_v6 = vpop.f32.mrb[6].mxu0 }
 0x656   : > { %v1474_v7 = vpop.f32.mrb[7].mxu0 }
 0x657   : > { %4960 = vmatprep.mubr.msk.f32.mxu1 %vm1339_vm2, %v1474_v7 }
 0x658   : > { %4961 = vmatmul.mubr.msk.f32.gmra.mrb[24].mxu1 %vm1339_vm2, %v4934_v6  ;;  %v7088_v5 = vpop.trf.xlu1 }
 0x659   : > { %v4937_v8 = vpop.f32.mrb[8].mxu0 }
 0x65a   : > { %v1484_v36 = vpop.f32.mrb[9].mxu0 }
 0x65b   : > { %4963 = vmatprep.mubr.msk.f32.mxu1 %vm1339_vm2, %v1484_v36 }
 0x65c   : > { %4964 = vmatmul.mubr.msk.f32.gmra.mrb[26].mxu1 %vm1339_vm2, %v4937_v8 }
 0x65d   : > { %v4940_v11 = vpop.f32.mrb[10].mxu0 }
 0x65e   : > { %v1494_v12 = vpop.f32.mrb[11].mxu0 }
 0x65f   : > { %4966 = vmatprep.mubr.msk.f32.mxu1 %vm1339_vm2, %v1494_v12 }
 0x660   : > { %4967 = vmatmul.mubr.msk.f32.gmra.mrb[28].mxu1 %vm1339_vm2, %v4940_v11 }
 0x661   : > { %v4943_v13 = vpop.f32.mrb[12].mxu0 }
 0x662   : > { %v1504_v14 = vpop.f32.mrb[13].mxu0 }
 0x663   : > { %4969 = vmatprep.mubr.msk.f32.mxu1 %vm1339_vm2, %v1504_v14 }
 0x664   : > { %4970 = vmatmul.mubr.msk.f32.gmra.mrb[30].mxu1 %vm1339_vm2, %v4943_v13 }
 0x665   : > { %v4946_v15 = vpop.f32.mrb[14].mxu0 }
 0x666   : > { %v1514_v19 = vpop.f32.mrb[15].mxu0 }
 0x667   : > { %4972 = vmatprep.mubr.msk.f32.mxu1 %vm1339_vm2, %v1514_v19 }
 0x668   : > { %4973 = vmatmul.mubr.msk.f32.gmra.mrb[32].mxu1 %vm1339_vm2, %v4946_v15  ;;  %v7094_v15 = vpop.trf.xlu1 }
 0x669   : > { %v4949_v20 = vpop.f32.mrb[16].mxu0 }
 0x66a   : > { %v1524_v21 = vpop.f32.mrb[17].mxu0 }
 0x66b   : > { %4975 = vmatprep.mubr.msk.f32.mxu1 %vm1339_vm2, %v1524_v21 }
 0x66c   : > { %4976 = vmatmul.mubr.msk.f32.gmra.mrb[34].mxu1 %vm1339_vm2, %v4949_v20 }
 0x66d   : > { %5010 = vmatprep.mubr.msk.f32.mxu1 %vm6343_vm3, %v7627_v23 }
 0x723   : > { %v4956_v32 = vpop.f32.mrb[20].mxu1 }
 0x724   : > { %v1727_v6 = vmul.f32 %v4956_v32, %v6843_v37  ;;  %v1647_v7 = vpop.f32.mrb[21].mxu1 }
 0x725   : > { %v1726_v8 = vmul.f32 %v1647_v7, %v6845_v38 }
 0x727   : > { %v5543_v36 = vpack.c.bf16 %v1727_v6, %v1726_v8  ;;  %v4959_v11 = vpop.f32.mrb[22].mxu1  ;;  %v1837_v8 = vpop.trf.xlu1 }
 0x728   : > { %v1729_v12 = vmul.f32 %v4959_v11, %v6849_v44  ;;  %v1657_v13 = vpop.f32.mrb[23].mxu1 }
 0x729   : > { %v1728_v14 = vmul.f32 %v1657_v13, %v6851_v45  ;;  %5544 = vmatpush3.bf16.msra.mxu1 %v5543_v36 }
 0x72a   : > { %5545 = vmatprep.subr.bf16.mxu1 %v6342_v22 }
 0x72b   : > { %v5546_v19 = vpack.c.bf16 %v1729_v12, %v1728_v14  ;;  %v4962_v20 = vpop.f32.mrb[24].mxu1 }
 0x72c   : > { %v1731_v21 = vmul.f32 %v4962_v20, %v6855_v51  ;;  %v1667_v32 = vpop.f32.mrb[25].mxu1 }
 0x72d   : > { %v1730_v23 = vmul.f32 %v1667_v32, %v6857_v52  ;;  %5547 = vmatpush3.bf16.msra.mxu1 %v5546_v19  ;;  %v1838_v32 = vpop.trf.xlu1 }
 0x72e   : > { %5548 = vmatprep.subr.bf16.mxu1 %v6342_v22 }
 0x72f   : > { %v5549_v6 = vpack.c.bf16 %v1731_v21, %v1730_v23  ;;  %v4965_v7 = vpop.f32.mrb[26].mxu1 }
 0x730   : > { %v1733_v11 = vmul.f32 %v4965_v7, %v6861_v58  ;;  %v1677_v36 = vpop.f32.mrb[27].mxu1 }
 0x731   : > { %v1732_v13 = vmul.f32 %v1677_v36, %v6863_v59  ;;  %5550 = vmatpush3.bf16.msra.mxu1 %v5549_v6 }
 0x732   : > { %5551 = vmatprep.subr.bf16.mxu1 %v6342_v22 }
 0x733   : > { %v5552_v12 = vpack.c.bf16 %v1733_v11, %v1732_v13  ;;  %v4968_v14 = vpop.f32.mrb[28].mxu1  ;;  %v1839_v13 = vpop.trf.xlu1 }
 0x734   : > { %v1735_v20 = vmul.f32 %v4968_v14, %v6867_v2  ;;  %v1687_v63 = vpop.f32.mrb[29].mxu1 }
 0x735   : > { %v1734_v19 = vmul.f32 %v1687_v63, %v6869_v3  ;;  %5553 = vmatpush3.bf16.msra.mxu1 %v5552_v12 }
 0x736   : > { %5554 = vmatprep.subr.bf16.mxu1 %v6342_v22 }
 0x737   : > { %v5555_v23 = vpack.c.bf16 %v1735_v20, %v1734_v19  ;;  %v4971_v21 = vpop.f32.mrb[30].mxu1 }
 0x738   : > { %v1737_v7 = vmul.f32 %v4971_v21, %v6873_v9  ;;  %v1697_v62 = vpop.f32.mrb[31].mxu1 }
 0x739   : > { %v1736_v6 = vmul.f32 %v1697_v62, %v6875_v10  ;;  %5556 = vmatpush3.bf16.msra.mxu1 %v5555_v23  ;;  %v1840_v23 = vpop.trf.xlu1 }
 0x73a   : > { %5557 = vmatprep.subr.bf16.mxu1 %v6342_v22 }
 0x73b   : > { %v5558_v11 = vpack.c.bf16 %v1737_v7, %v1736_v6  ;;  %v4974_v36 = vpop.f32.mrb[32].mxu1  ;;  %v1847_v6 = vrot.slane %v6818_v16, 4 }
 0x73c   : > { %v1739_v14 = vmul.f32 %v4974_v36, %v6879_v17  ;;  %v1707_v63 = vpop.f32.mrb[33].mxu1 }
 0x73d   : > { %v1738_v12 = vmul.f32 %v1707_v63, %v6881_v18  ;;  %5559 = vmatpush3.bf16.msra.mxu1 %v5558_v11  ;;  %v1841_v11 = vpop.trf.xlu1 }
 0x73e   : > { %5560 = vmatprep.subr.bf16.mxu1 %v6342_v22 }
 0x73f   : > { %v5561_v20 = vpack.c.bf16 %v1739_v14, %v1738_v12  ;;  %v4977_v19 = vpop.f32.mrb[34].mxu1 }
 0x740   : > { %v1741_v21 = vmul.f32 %v4977_v19, %v6885_v24  ;;  %v1717_v60 = vpop.f32.mrb[35].mxu1 }
 0x741   : > { %v1740_v62 = vmul.f32 %v1717_v60, %v6887_v25  ;;  %5562 = vmatpush3.bf16.msra.mxu1 %v5561_v20  ;;  %v1842_v16 = vpop.trf.xlu1 }
 0x742   : > { %5563 = vmatprep.subr.bf16.mxu1 %v6342_v22 }
 0x743   : > { %v5564_v7 = vpack.c.bf16 %v1741_v21, %v1740_v62 }
 0x745   : > { %5565 = vmatpush3.bf16.msra.mxu1 %v5564_v7 }
 0x746   : > { %5013 = vmatprep.subr.msk.mxu1 %vm820_vm0, %v1847_v6 }
 0x748   : > { %5011 = vmatmul.mubr.f32.vlgmr.msra.gmra.mrb[36].mxu1 %v6784_v0  ;;  %v1843_v0 = vpop.trf.xlu1 }
 0x749   : > { %5014 = vmatpush3.msk.msra.mxu1 %vm820_vm0, %v1847_v6  ;;  %5015 = vmatprep.mubr.msk.f32.mxu1 %vm813_vm1, %v7080_v26 }
 0x74a   : > { %5599 = vmatprep.subr.bf16.mxu1 %v6903_v33 }
 0x74c   : > { %5016 = vmatmul.mubr.msk.f32.vlgmr.msra.gmra.mrb[38].mxu1 %vm813_vm1, %v7082_v27 }
 0x74d   : > { %5018 = vmatprep.mubr.msk.f32.mxu1 %vm813_vm1, %v7084_v28  ;;  %5601 = vmatpush3.bf16.msra.mxu1 %v6903_v33  ;;  %v1844_v33 = vpop.trf.xlu1 }
 0x74e   : > { %5603 = vmatprep.subr.bf16.mxu1 %v6920_v40 }
 0x750   : > { %5019 = vmatmul.mubr.msk.f32.gmra.mrb[40].mxu1 %vm813_vm1, %v7086_v31 }
 0x751   : > { %5021 = vmatprep.mubr.msk.f32.mxu1 %vm813_vm1, %v7088_v5  ;;  %5605 = vmatpush3.bf16.msra.mxu1 %v6920_v40  ;;  %v1845_v40 = vpop.trf.xlu1 }
 0x752   : > { %5607 = vmatprep.subr.bf16.mxu1 %v6937_v43 }
 0x754   : > { %5022 = vmatmul.mubr.msk.f32.gmra.mrb[42].mxu1 %vm813_vm1, %v7094_v15 }
 0x755   : > { %5024 = vmatprep.mubr.msk.f32.mxu1 %vm813_vm1, %v1837_v8  ;;  %5609 = vmatpush3.bf16.msra.mxu1 %v6937_v43  ;;  %v1846_v43 = vpop.trf.xlu1 }
 0x756   : > { %5611 = vmatprep.subr.bf16.mxu1 %v6953_v48 }
 0x758   : > { %5025 = vmatmul.mubr.msk.f32.gmra.mrb[44].mxu1 %vm813_vm1, %v1838_v32 }
 0x759   : > { %5027 = vmatprep.mubr.msk.f32.mxu1 %vm813_vm1, %v1839_v13  ;;  %5613 = vmatpush3.bf16.msra.mxu1 %v6953_v48 }
 0x75a   : > { %5615 = vmatprep.subr.bf16.mxu1 %v6969_v53 }
 0x75c   : > { %5028 = vmatmul.mubr.msk.f32.gmra.mrb[46].mxu1 %vm813_vm1, %v1840_v23 }
 0x75d   : > { %5030 = vmatprep.mubr.msk.f32.mxu1 %vm813_vm1, %v1841_v11  ;;  %5617 = vmatpush3.bf16.msra.mxu1 %v6969_v53 }
 0x75e   : > { %5619 = vmatprep.subr.bf16.mxu1 %v6985_v56 }
 0x760   : > { %5031 = vmatmul.mubr.msk.f32.gmra.mrb[48].mxu1 %vm813_vm1, %v1842_v16 }
 0x761   : > { %5033 = vmatprep.mubr.msk.f32.mxu1 %vm813_vm1, %v1843_v0  ;;  %5621 = vmatpush3.bf16.msra.mxu1 %v6985_v56 }
 0x762   : > { %5623 = vmatprep.subr.bf16.mxu1 %v7001_v61 }
 0x764   : > { %5034 = vmatmul.mubr.msk.f32.gmra.mrb[50].mxu1 %vm813_vm1, %v1844_v33 }
 0x765   : > { %5036 = vmatprep.mubr.msk.f32.mxu1 %vm813_vm1, %v1845_v40  ;;  %5625 = vmatpush3.bf16.msra.mxu1 %v7001_v61 }
 0x766   : > { %5627 = vmatprep.subr.bf16.mxu1 %v7017_v1 }
 0x768   : > { %5037 = vmatmul.mubr.msk.f32.gmra.mrb[52].mxu1 %vm813_vm1, %v1846_v43 }
 0x769   : > { %5629 = vmatpush3.bf16.msra.mxu1 %v7017_v1 }
 0x76a   : > { %5635 = vmatprep.subr.bf16.mxu1 %v7022_v4 }
 0x81b   : > { %v7158_v48 = vpop.f32.mrb[36].mxu1 }
 0x81c   : > { %v5012_v53 = vpop.f32.mrb[37].mxu1 }
 0x81f   : > { %v5017_v56 = vpop.f32.mrb[38].mxu1 }
 0x820   : > { %v2044_v60 = vmul.f32 %v5017_v56, %v6843_v37  ;;  %v1964_v26 = vpop.f32.mrb[39].mxu1 }
 0x821   : > { %v2043_v27 = vmul.f32 %v1964_v26, %v6845_v38 }
 0x823   : > { %v5566_v28 = vpack.c.bf16 %v2044_v60, %v2043_v27  ;;  %v5020_v31 = vpop.f32.mrb[40].mxu1 }
 0x824   : > { %v2046_v61 = vmul.f32 %v5020_v31, %v6849_v44  ;;  %v1974_v5 = vpop.f32.mrb[41].mxu1 }
 0x825   : > { %v2045_v15 = vmul.f32 %v1974_v5, %v6851_v45  ;;  %5567 = vmatprep.subr.bf16.mxu0 %v5566_v28 }
 0x826   : > { %5569 = vmatpush3.bf16.msra.mxu0 %v5566_v28 }
 0x827   : > { %v5570_v1 = vpack.c.bf16 %v2046_v61, %v2045_v15  ;;  %v5023_v8 = vpop.f32.mrb[42].mxu1 }
 0x828   : > { %v2048_v32 = vmul.f32 %v5023_v8, %v6855_v51  ;;  %v1984_v36 = vpop.f32.mrb[43].mxu1 }
 0x829   : > { %v2047_v13 = vmul.f32 %v1984_v36, %v6857_v52  ;;  %5571 = vmatprep.subr.bf16.mxu0 %v5570_v1 }
 0x82a   : > { %5573 = vmatpush3.bf16.msra.mxu0 %v5570_v1 }
 0x82b   : > { %v5574_v14 = vpack.c.bf16 %v2048_v32, %v2047_v13  ;;  %v5026_v63 = vpop.f32.mrb[44].mxu1 }
 0x82c   : > { %v2050_v12 = vmul.f32 %v5026_v63, %v6861_v58  ;;  %v1994_v20 = vpop.f32.mrb[45].mxu1  ;;  %v2214_v63 = vstv %s4387_s8 }
 0x82d   : > { %v2049_v19 = vmul.f32 %v1994_v20, %v6863_v59  ;;  %5575 = vmatprep.subr.bf16.mxu0 %v5574_v14 }
 0x82e   : > { %5577 = vmatpush3.bf16.msra.mxu0 %v5574_v14 }
 0x82f   : > { %v5578_v21 = vpack.c.bf16 %v2050_v12, %v2049_v19  ;;  %v5029_v62 = vpop.f32.mrb[46].mxu1  ;;  %v2219_v12 = vld [vmem:[#allocation9 + $0x18] sm:$0xff]  ;;  %v2218_v19 = vld [vmem:[#allocation9 + $0x10] sm:$0xff] }
 0x830   : > { %v2052_v23 = vmul.f32 %v5029_v62, %v6867_v2  ;;  %v2004_v7 = vpop.f32.mrb[47].mxu1 }
 0x831   : > { %v2051_v6 = vmul.f32 %v2004_v7, %v6869_v3  ;;  %5579 = vmatprep.subr.bf16.mxu0 %v5578_v21 }
 0x832   : > { %5581 = vmatpush3.bf16.msra.mxu0 %v5578_v21 }
 0x833   : > { %v5582_v11 = vpack.c.bf16 %v2052_v23, %v2051_v6  ;;  %v5032_v16 = vpop.f32.mrb[48].mxu1 }
 0x834   : > { %v2054_v0 = vmul.f32 %v5032_v16, %v6873_v9  ;;  %v2014_v33 = vpop.f32.mrb[49].mxu1 }
 0x835   : > { %v2053_v40 = vmul.f32 %v2014_v33, %v6875_v10  ;;  %5583 = vmatprep.subr.bf16.mxu0 %v5582_v11 }
 0x836   : > { %5585 = vmatpush3.bf16.msra.mxu0 %v5582_v11 }
 0x837   : > { %v5586_v43 = vpack.c.bf16 %v2054_v0, %v2053_v40  ;;  %v5035_v53 = vpop.f32.mrb[50].mxu1 }
 0x838   : > { %v2056_v56 = vmul.f32 %v5035_v53, %v6879_v17  ;;  %v2024_v60 = vpop.f32.mrb[51].mxu1 }
 0x839   : > { %v2055_v26 = vmul.f32 %v2024_v60, %v6881_v18  ;;  %5587 = vmatprep.subr.bf16.mxu0 %v5586_v43 }
 0x83a   : > { %5589 = vmatpush3.bf16.msra.mxu0 %v5586_v43 }
 0x83b   : > { %v5590_v27 = vpack.c.bf16 %v2056_v56, %v2055_v26  ;;  %v5038_v28 = vpop.f32.mrb[52].mxu1 }
 0x83c   : > { %v2058_v31 = vmul.f32 %v5038_v28, %v6885_v24  ;;  %v2034_v61 = vpop.f32.mrb[53].mxu1 }
 0x83d   : > { %v2057_v5 = vmul.f32 %v2034_v61, %v6887_v25  ;;  %5591 = vmatprep.subr.bf16.mxu0 %v5590_v27 }
 0x83e   : > { %5593 = vmatpush3.bf16.msra.mxu0 %v5590_v27 }
 0x83f   : > { %v5594_v15 = vpack.c.bf16 %v2058_v31, %v2057_v5 }
 0x841   : > { %5595 = vmatprep.subr.bf16.mxu0 %v5594_v15 }
 0x842   : > { %5597 = vmatpush3.bf16.msra.mxu0 %v5594_v15 }
 0x845   : > { %5072 = vmatmul.mubr.f32.vlgmr.msra.gmra.mrb[18].mxu0 %v6915_v39 }
 0x846   : > { %5113 = vmatprep.mubr.msk.f32.mxu0 %vm1339_vm2, %v6893_v29 }
 0x918   : > { %v5073_v1 = vpop.f32.mrb[18].mxu0 }
 0x919   : > { %v2125_v8 = vpop.f32.mrb[19].mxu0 }
 0x91a   : > { %5106 = vmatprep.mubr.f32.mxu1 %v2125_v8 }
 0x91b   : > { %5107 = vmatmul.mubr.f32.vlgmr.msra.gmra.mrb[54].mxu1 %v5073_v1 }
 0x91c   : > { %5637 = vmatpush3.bf16.msra.mxu1 %v7022_v4 }
 0x91d   : > { %5662 = vmatprep.subr.bf16.mxu1 %v6342_v22 }
 0x9ee   : > { %v5108_v32 = vpop.f32.mrb[54].mxu1 }
 0x9ef   : > { %v2210_v36 = vmul.f32 0.03125, %v5108_v32  ;;  %v2200_v13 = vpop.f32.mrb[55].mxu1 }
 0x9f0   : > { %v2209_v14 = vmul.f32 0.03125, %v2200_v13 }
 0x9f1   : > { %5967 = vtanh.f32 %v2210_v36 }
 0x9f2   : > { %5969 = vtanh.f32 %v2209_v14 }
 0x9fb   : > { %v5968_v39 = vpop.eup %5967 }
 0x9fc   : > { %v5970_v20 = vpop.eup %5969  ;;  %v2216_v29 = vmul.f32 %v5968_v39, %v2214_v63 }
 0x9fd   : > { %v2215_v21 = vmul.f32 %v5970_v20, %v2214_v63 }
 0x9fe   : > { %v2221_v62 = vadd.f32 %v2219_v12, %v2216_v29 }
 0x9ff   : > { %v2220_v23 = vadd.f32 %v2218_v19, %v2215_v21 }
 0xa01   : > { %v5630_v7 = vpack.c.bf16 %v2221_v62, %v2220_v23 }
 0xa03   : > { %5631 = vmatprep.subr.bf16.mxu0 %v5630_v7 }
 0xa04   : > { %5633 = vmatpush3.bf16.msra.mxu0 %v5630_v7 }
 0xa05   : > { %5638 = vmatprep.subr.bf16.mxu0 %v6342_v22 }
 0xa07   : > { %5114 = vmatmul.mubr.msk.f32.vlgmr.msra.gmra.mrb[20].mxu0 %vm1339_vm2, %v6898_v30  ;;  %v7685_v30 = vld [vmem:[#allocation27_spill] sm:$0xff] }
 0xa08   : > { %5116 = vmatprep.mubr.msk.f32.mxu0 %vm1339_vm2, %v6908_v34  ;;  %v7686_v34 = vld [vmem:[#allocation28_spill] sm:$0xff] }
 0xa0b   : > { %5117 = vmatmul.mubr.msk.f32.gmra.mrb[22].mxu0 %vm1339_vm2, %v6913_v35  ;;  %v7687_v35 = vld [vmem:[#allocation29_spill] sm:$0xff] }
 0xa0c   : > { %5119 = vmatprep.mubr.msk.f32.mxu0 %vm1339_vm2, %v6925_v41  ;;  %v7688_v41 = vmov 0.0  }
 0xa0f   : > { %5120 = vmatmul.mubr.msk.f32.gmra.mrb[24].mxu0 %vm1339_vm2, %v6930_v42 }
 0xa10   : > { %5122 = vmatprep.mubr.msk.f32.mxu0 %vm1339_vm2, %v6942_v46 }
 0xa13   : > { %5123 = vmatmul.mubr.msk.f32.gmra.mrb[26].mxu0 %vm1339_vm2, %v6947_v47 }
 0xa14   : > { %5125 = vmatprep.mubr.msk.f32.mxu0 %vm1339_vm2, %v6958_v49 }
 0xa17   : > { %5126 = vmatmul.mubr.msk.f32.gmra.mrb[28].mxu0 %vm1339_vm2, %v6963_v50 }
 0xa18   : > { %5128 = vmatprep.mubr.msk.f32.mxu0 %vm1339_vm2, %v6974_v54 }
 0xa1b   : > { %5129 = vmatmul.mubr.msk.f32.gmra.mrb[30].mxu0 %vm1339_vm2, %v6979_v55 }
 0xa1c   : > { %5131 = vmatprep.mubr.msk.f32.mxu0 %vm1339_vm2, %v6990_v57 }
 0xa1f   : > { %5132 = vmatmul.mubr.msk.f32.gmra.mrb[32].mxu0 %vm1339_vm2, %v7685_v30 }
 0xa20   : > { %5134 = vmatprep.mubr.msk.f32.mxu0 %vm1339_vm2, %v7686_v34 }
 0xa23   : > { %5135 = vmatmul.mubr.msk.f32.gmra.mrb[34].mxu0 %vm1339_vm2, %v7687_v35  ;;  %v2887_v35 = vld [vmem:[#allocation13 + $0x10] sm:$0xff] }
 0xa24   : > { %5197 = vmatprep.mubr.msk.f32.mxu0 %vm6343_vm3, %v7688_v41 }
 0xada   : > { %v5115_v42 = vpop.f32.mrb[20].mxu0 }
 0xadb   : > { %v2288_v46 = vpop.f32.mrb[21].mxu0 }
 0xadc   : > { %5141 = vmatprep.mubr.msk.f32.mxu1 %vm1339_vm2, %v2288_v46  ;;  %v2888_v46 = vld [vmem:[#allocation13 + $0x18] sm:$0xff] }
 0xadd   : > { %5142 = vmatmul.mubr.msk.f32.vlgmr.msra.gmra.mrb[56].mxu1 %vm1339_vm2, %v5115_v42 }
 0xade   : > { %v5118_v47 = vpop.f32.mrb[22].mxu0 }
 0xadf   : > { %v2298_v49 = vpop.f32.mrb[23].mxu0 }
 0xae0   : > { %5144 = vmatprep.mubr.msk.f32.mxu1 %vm1339_vm2, %v2298_v49  ;;  %v2889_v49 = vld [vmem:[#allocation13 + $0x20] sm:$0xff] }
 0xae1   : > { %5145 = vmatmul.mubr.msk.f32.gmra.mrb[58].mxu1 %vm1339_vm2, %v5118_v47  ;;  %v5666_v47 = vpack.c.bf16 %v2888_v46, %v2887_v35  ;;  %v3373_v35 = vld [vmem:[#allocation13 + $0x138] sm:$0xff]  ;;  %v3140_v46 = vld [vmem:[#allocation13 + $0xe0] sm:$0xff] }
 0xae2   : > { %v5121_v50 = vpop.f32.mrb[24].mxu0 }
 0xae3   : > { %v2308_v54 = vpop.f32.mrb[25].mxu0 }
 0xae4   : > { %5147 = vmatprep.mubr.msk.f32.mxu1 %vm1339_vm2, %v2308_v54 }
 0xae5   : > { %5148 = vmatmul.mubr.msk.f32.gmra.mrb[60].mxu1 %vm1339_vm2, %v5121_v50  ;;  %v2890_v50 = vld [vmem:[#allocation13 + $0x28] sm:$0xff] }
 0xae6   : > { %v5124_v55 = vpop.f32.mrb[26].mxu0  ;;  %v5669_v54 = vpack.c.bf16 %v2890_v50, %v2889_v49  ;;  %v3374_v50 = vld [vmem:[#allocation13 + $0x140] sm:$0xff] }
 0xae7   : > { %v2318_v57 = vpop.f32.mrb[27].mxu0 }
 0xae8   : > { %5150 = vmatprep.mubr.msk.f32.mxu1 %vm1339_vm2, %v2318_v57  ;;  %v2892_v57 = vld [vmem:[#allocation13 + $0x38] sm:$0xff] }
 0xae9   : > { %5151 = vmatmul.mubr.msk.f32.gmra.mrb[62].mxu1 %vm1339_vm2, %v5124_v55  ;;  %v2891_v55 = vld [vmem:[#allocation13 + $0x30] sm:$0xff] }
 0xaea   : > { %v5127_v4 = vpop.f32.mrb[28].mxu0 }
 0xaeb   : > { %v2328_v6 = vpop.f32.mrb[29].mxu0 }
 0xaec   : > { %5153 = vmatprep.mubr.msk.f32.mxu1 %vm1339_vm2, %v2328_v6  ;;  %v2893_v6 = vld [vmem:[#allocation13 + $0x40] sm:$0xff] }
 0xaed   : > { %5154 = vmatmul.mubr.msk.f32.gmra.mrb[64].mxu1 %vm1339_vm2, %v5127_v4  ;;  %v5672_v4 = vpack.c.bf16 %v2892_v57, %v2891_v55  ;;  %v3142_v57 = vld [vmem:[#allocation13 + $0xf0] sm:$0xff] }
 0xaee   : > { %v5130_v11 = vpop.f32.mrb[30].mxu0 }
 0xaef   : > { %v2338_v16 = vpop.f32.mrb[31].mxu0 }
 0xaf0   : > { %5156 = vmatprep.mubr.msk.f32.mxu1 %vm1339_vm2, %v2338_v16 }
 0xaf1   : > { %5157 = vmatmul.mubr.msk.f32.gmra.mrb[66].mxu1 %vm1339_vm2, %v5130_v11  ;;  %v2894_v11 = vld [vmem:[#allocation13 + $0x48] sm:$0xff] }
 0xaf2   : > { %v5133_v0 = vpop.f32.mrb[32].mxu0  ;;  %v5675_v16 = vpack.c.bf16 %v2894_v11, %v2893_v6  ;;  %v3376_v11 = vld [vmem:[#allocation13 + $0x150] sm:$0xff] }
 0xaf3   : > { %v2348_v33 = vpop.f32.mrb[33].mxu0 }
 0xaf4   : > { %5159 = vmatprep.mubr.msk.f32.mxu1 %vm1339_vm2, %v2348_v33  ;;  %v2896_v33 = vld [vmem:[#allocation13 + $0x58] sm:$0xff] }
 0xaf5   : > { %5160 = vmatmul.mubr.msk.f32.gmra.mrb[68].mxu1 %vm1339_vm2, %v5133_v0  ;;  %v2895_v0 = vld [vmem:[#allocation13 + $0x50] sm:$0xff] }
 0xaf6   : > { %v5136_v40 = vpop.f32.mrb[34].mxu0 }
 0xaf7   : > { %v2358_v43 = vpop.f32.mrb[35].mxu0 }
 0xaf8   : > { %5162 = vmatprep.mubr.msk.f32.mxu1 %vm1339_vm2, %v2358_v43  ;;  %v2897_v43 = vld [vmem:[#allocation13 + $0x60] sm:$0xff] }
 0xaf9   : > { %5163 = vmatmul.mubr.msk.f32.gmra.mrb[70].mxu1 %vm1339_vm2, %v5136_v40  ;;  %v5678_v40 = vpack.c.bf16 %v2896_v33, %v2895_v0 }
 0xafa   : > { %5247 = vmatprep.mubr.msk.f32.mxu1 %vm6343_vm3, %v7688_v41 }
 0xbb0   : > { %v5143_v53 = vpop.f32.mrb[56].mxu1 }
 0xbb1   : > { %v2561_v56 = vmul.f32 %v5143_v53, %v6843_v37  ;;  %v2481_v60 = vpop.f32.mrb[57].mxu1  ;;  %v2898_v53 = vld [vmem:[#allocation13 + $0x68] sm:$0xff] }
 0xbb2   : > { %v2560_v26 = vmul.f32 %v2481_v60, %v6845_v38  ;;  %v2899_v60 = vld [vmem:[#allocation13 + $0x70] sm:$0xff] }
 0xbb4   : > { %v5639_v27 = vpack.c.bf16 %v2561_v56, %v2560_v26  ;;  %v5146_v28 = vpop.f32.mrb[58].mxu1  ;;  %v5681_v56 = vpack.c.bf16 %v2898_v53, %v2897_v43  ;;  %v2900_v26 = vld [vmem:[#allocation13 + $0x78] sm:$0xff]  ;;  %v3378_v43 = vld [vmem:[#allocation13 + $0x160] sm:$0xff]  ;;  %v3379_v53 = vld [vmem:[#allocation13 + $0x168] sm:$0xff] }
 0xbb5   : > { %v2563_v31 = vmul.f32 %v5146_v28, %v6849_v44  ;;  %v2491_v61 = vpop.f32.mrb[59].mxu1  ;;  %v4422_v28 = vld [vmem:[%s7690_s1 + $0x8] sm:$0xff] }
 0xbb6   : > { %v2562_v5 = vmul.f32 %v2491_v61, %v6851_v45  ;;  %5640 = vmatpush3.bf16.msra.mxu0 %v5639_v27  ;;  %v5684_v27 = vpack.c.bf16 %v2900_v26, %v2899_v60  ;;  %v3380_v60 = vld [vmem:[#allocation13 + $0x170] sm:$0xff]  ;;  %v3381_v26 = vld [vmem:[#allocation13 + $0x178] sm:$0xff] }
 0xbb7   : > { %5641 = vmatprep.subr.bf16.mxu0 %v6342_v22 }
 0xbb8   : > { %v5642_v15 = vpack.c.bf16 %v2563_v31, %v2562_v5  ;;  %v5149_v1 = vpop.f32.mrb[60].mxu1 }
 0xbb9   : > { %v2565_v8 = vmul.f32 %v5149_v1, %v6855_v51  ;;  %v2501_v32 = vpop.f32.mrb[61].mxu1  ;;  %v2730_v1 = vld [vmem:[%s7690_s1] sm:$0xff] }
 0xbba   : > { %v2564_v37 = vmul.f32 %v2501_v32, %v6857_v52  ;;  %5643 = vmatpush3.bf16.msra.mxu0 %v5642_v15  ;;  %v3128_v32 = vld [vmem:[#allocation13 + $0x80] sm:$0xff] }
 0xbbb   : > { %5644 = vmatprep.subr.bf16.mxu0 %v6342_v22 }
 0xbbc   : > { %v5645_v38 = vpack.c.bf16 %v2565_v8, %v2564_v37  ;;  %v5152_v36 = vpop.f32.mrb[62].mxu1  ;;  %v4427_v8 = vld [vmem:[%s7690_s1 + $0x10] sm:$0xff]  ;;  %v3129_v37 = vld [vmem:[#allocation13 + $0x88] sm:$0xff] }
 0xbbd   : > { %v2567_v44 = vmul.f32 %v5152_v36, %v6861_v58  ;;  %v2511_v13 = vpop.f32.mrb[63].mxu1  ;;  %v5687_v36 = vpack.c.bf16 %v3129_v37, %v3128_v32  ;;  %v2974_v37 = vpop.permute.xlu0 %2973 }
 0xbbe   : > { %v2566_v45 = vmul.f32 %v2511_v13, %v6863_v59  ;;  %5646 = vmatpush3.bf16.msra.mxu0 %v5645_v38  ;;  %v3130_v38 = vld [vmem:[#allocation13 + $0x90] sm:$0xff] }
 0xbbf   : > { %5647 = vmatprep.subr.bf16.mxu0 %v6342_v22 }
 0xbc0   : > { %v5648_v14 = vpack.c.bf16 %v2567_v44, %v2566_v45  ;;  %v5155_v63 = vpop.f32.mrb[64].mxu1  ;;  %v3131_v44 = vld [vmem:[#allocation13 + $0x98] sm:$0xff]  ;;  %v3132_v45 = vld [vmem:[#allocation13 + $0xa0] sm:$0xff] }
 0xbc1   : > { %v2569_v51 = vmul.f32 %v5155_v63, %v6867_v2  ;;  %v2521_v39 = vpop.f32.mrb[65].mxu1  ;;  %v5690_v13 = vpack.c.bf16 %v3131_v44, %v3130_v38 }
 0xbc2   : > { %v2568_v52 = vmul.f32 %v2521_v39, %v6869_v3  ;;  %5649 = vmatpush3.bf16.msra.mxu0 %v5648_v14  ;;  %v3133_v14 = vld [vmem:[#allocation13 + $0xa8] sm:$0xff]  ;;  %v3135_v39 = vld [vmem:[#allocation13 + $0xb8] sm:$0xff] }
 0xbc3   : > { %5650 = vmatprep.subr.bf16.mxu0 %v6342_v22  ;;  %v5693_v63 = vpack.c.bf16 %v3133_v14, %v3132_v45  ;;  %v2651_v45 = vpop.permute.xlu0 %2650 }
 0xbc4   : > { %v5651_v12 = vpack.c.bf16 %v2569_v51, %v2568_v52  ;;  %v5158_v20 = vpop.f32.mrb[66].mxu1  ;;  %v3134_v51 = vld [vmem:[#allocation13 + $0xb0] sm:$0xff] }
 0xbc5   : > { %v2571_v58 = vmul.f32 %v5158_v20, %v6873_v9  ;;  %v2531_v29 = vpop.f32.mrb[67].mxu1  ;;  %v5696_v52 = vpack.c.bf16 %v3135_v39, %v3134_v51  ;;  %v3137_v20 = vld [vmem:[#allocation13 + $0xc8] sm:$0xff] }
 0xbc6   : > { %v2570_v59 = vmul.f32 %v2531_v29, %v6875_v10  ;;  %5652 = vmatpush3.bf16.msra.mxu0 %v5651_v12  ;;  %v3136_v12 = vld [vmem:[#allocation13 + $0xc0] sm:$0xff]  ;;  %v3138_v29 = vld [vmem:[#allocation13 + $0xd0] sm:$0xff] }
 0xbc7   : > { %5653 = vmatprep.subr.bf16.mxu0 %v6342_v22 }
 0xbc8   : > { %v5654_v19 = vpack.c.bf16 %v2571_v58, %v2570_v59  ;;  %v5161_v21 = vpop.f32.mrb[68].mxu1  ;;  %v5699_v58 = vpack.c.bf16 %v3137_v20, %v3136_v12  ;;  %v3139_v59 = vld [vmem:[#allocation13 + $0xd8] sm:$0xff]  ;;  %v3457_v20 = vld [vmem:[#allocation15] sm:$0xff] }
 0xbc9   : > { %v2573_v2 = vmul.f32 %v5161_v21, %v6879_v17  ;;  %v2541_v62 = vpop.f32.mrb[69].mxu1  ;;  %v5971_v17 = vld [vmem:[%s6761_s21] sm:$0xf] }
 0xbca   : > { %v2572_v3 = vmul.f32 %v2541_v62, %v6881_v18  ;;  %5655 = vmatpush3.bf16.msra.mxu0 %v5654_v19  ;;  %v2646_v18 = vld [vmem:[%s7689_s30] sm:$0xff]  ;;  %v5702_v19 = vpack.c.bf16 %v3139_v59, %v3138_v29  ;;  %v4428_v62 = vld [vmem:[%s7690_s1 + $0x18] sm:$0xff]  ;;  %v3462_v29 = vpop.permute.xlu0 %3461  ;;  %s795_s30 = scalar_lea.vmem [#allocation19], %s4317_s11  ;;  %s6245_s11 = sshll.u32 %s6345_s29, 4  ;;  %s6246_s11 = int_to_ptr.vmem [resolvable:$false] %s6245_s11 }
 0xbcb   : > { %5656 = vmatprep.subr.bf16.mxu0 %v6342_v22  ;;  %s4134_s21 = sshll.u32 %s795_s30, 4  ;;  %s7549_s21 = int_to_ptr.vmem [resolvable:$true] %s4134_s21 }
 0xbcc   : > { %v5657_v23 = vpack.c.bf16 %v2573_v2, %v2572_v3  ;;  %v5164_v7 = vpop.f32.mrb[70].mxu1  ;;  %v4434_v3 = vld [vmem:[%s7690_s1 + $0x28] sm:$0xff]  ;;  %s6241_s8 = scalar_lea.vmem %s7549_s21, 128  ;;  %p6248_p8 = scmp.lt.s32.totalorder %s7549_s21, %s6246_s11 }
 0xbcd   : > { %v2575_v9 = vmul.f32 %v5164_v7, %v6885_v24  ;;  %v2551_v30 = vpop.f32.mrb[71].mxu1  ;;  %v2885_v24 = vld [vmem:[#allocation13] sm:$0xff]  ;;  %v3367_v7 = vld [vmem:[#allocation13 + $0x108] sm:$0xff]  ;;  %p6242_p0 = scmp.ne.s32.totalorder %s7549_s21, %s6241_s8 }
 0xbce   : > { %v2574_v10 = vmul.f32 %v2551_v30, %v6887_v25  ;;  %5658 = vmatpush3.bf16.msra.mxu0 %v5657_v23  ;;  %v2886_v25 = vld [vmem:[#allocation13 + $0x8] sm:$0xff]  ;;  %v3366_v23 = vld [vmem:[#allocation13 + $0x100] sm:$0xff] }
 0xbcf   : > { %5659 = vmatprep.subr.bf16.mxu0 %v6342_v22  ;;  %v5663_v42 = vpack.c.bf16 %v2886_v25, %v2885_v24  ;;  %v5711_v30 = vpack.c.bf16 %v3367_v7, %v3366_v23  ;;  %v3372_v25 = vld [vmem:[#allocation13 + $0x130] sm:$0xff]  ;;  %v3697_v23 = vld [vmem:[%s7691_s3] sm:$0xff]  ;;  %p6243_p5 = pnand %p6242_p0, %p7693_p2 }
 0xbd0   : > { %v5660_v34 = vpack.c.bf16 %v2575_v9, %v2574_v10  ;;  %v4433_v9 = vld [vmem:[%s7690_s1 + $0x20] sm:$0xff]  ;;  %v3368_v10 = vld [vmem:[#allocation13 + $0x110] sm:$0xff]  ;;  %s6247_s1 = scalar_lea.vmem %s6246_s11, 256 }
 0xbd1   : > { %5664 = vmatpush3.bf16.msra.mxu1 %v5663_v42  ;;  %v5720_v42 = vpack.c.bf16 %v3373_v35, %v3372_v25  ;;  %v3698_v7 = vld [vmem:[%s7691_s3 + $0x8] sm:$0xff]  ;;  %p6244_p13 = pneg %p6243_p5  ;;  %p6249_p7 = scmp.lt.s32.totalorder %s6247_s1, %s6241_s8 }
 0xbd2   : > { %5661 = vmatpush3.bf16.msra.mxu0 %v5660_v34  ;;  %5665 = vmatprep.subr.bf16.mxu1 %v6342_v22  ;;  %v3369_v34 = vld [vmem:[#allocation13 + $0x118] sm:$0xff]  ;;  %v3702_v25 = vld [vmem:[%s7691_s3 + $0x28] sm:$0xff] }
 0xbd3   : > { %5200 = vmatprep.subr.mxu0 %v7688_v41  ;;  %p6250_p6 = por %p6249_p7, %p6248_p8 }
 0xbd5   : > { %5198 = vmatmul.mubr.f32.vlgmr.msra.gmra.mrb[36].mxu0 %v5971_v17  ;;  %5667 = vmatpush3.bf16.msra.mxu1 %v5666_v47  ;;  %v3141_v47 = vld [vmem:[#allocation13 + $0xe8] sm:$0xff]  ;;  %p6251_p3 = pnand %p6250_p6, %p6244_p13 }
 0xbd6   : > { %5201 = vmatpush3.msk.msra.mxu0 %vm820_vm0, %v5971_v17  ;;  %5202 = vmatprep.mubr.msk.f32.mxu0 %vm6343_vm3, %v7688_v41  ;;  %v5714_v17 = vpack.c.bf16 %v3369_v34, %v3368_v10  ;;  %v5705_v49 = vpack.c.bf16 %v3141_v47, %v3140_v46  ;;  %v5735_v10 = vpack.c.bf16 %v3698_v7, %v3697_v23  ;;  %v3699_v34 = vld [vmem:[%s7691_s3 + $0x10] sm:$0xff]  ;;  %v3704_v46 = vld [vmem:[%s7691_s3 + $0x38] sm:$0xff]  ;;  %v4464_v7 = vld [vmem:[%s7691_s3 + $0x120] sm:$0xff] }
 0xbd7   : > { %5205 = vmatprep.subr.mxu0 %v7688_v41  ;;  %5668 = vmatprep.subr.bf16.mxu1 %v6342_v22 }
 0xbd9   : > { %5203 = vmatmul.mubr.msk.f32.vlgmr.msra.gmra.mrb[38].mxu0 %vm813_vm1, %v2646_v18  ;;  %5670 = vmatpush3.bf16.msra.mxu1 %v5669_v54  ;;  %v3371_v18 = vld [vmem:[#allocation13 + $0x128] sm:$0xff] }
 0xbda   : > { %5207 = vmatprep.mubr.msk.f32.mxu0 %vm6343_vm3, %v7688_v41  ;;  %5671 = vmatprep.subr.bf16.mxu1 %v6342_v22  ;;  %v3375_v54 = vld [vmem:[#allocation13 + $0x148] sm:$0xff] }
 0xbdb   : > { %v5723_v55 = vpack.c.bf16 %v3375_v54, %v3374_v50  ;;  %v3706_v50 = vld [vmem:[%s7691_s3 + $0x48] sm:$0xff] }
 0xbdd   : > { %5673 = vmatpush3.bf16.msra.mxu1 %v5672_v4  ;;  %v3143_v4 = vld [vmem:[#allocation13 + $0xf8] sm:$0xff] }
 0xbde   : > { %5674 = vmatprep.subr.bf16.mxu1 %v6342_v22  ;;  %v5708_v6 = vpack.c.bf16 %v3143_v4, %v3142_v57  ;;  %v3708_v57 = vld [vmem:[%s7691_s3 + $0x58] sm:$0xff] }
 0xbe1   : > { %5676 = vmatpush3.bf16.msra.mxu1 %v5675_v16  ;;  %v3377_v16 = vld [vmem:[#allocation13 + $0x158] sm:$0xff] }
 0xbe2   : > { %5677 = vmatprep.subr.bf16.mxu1 %v6342_v22  ;;  %v5726_v33 = vpack.c.bf16 %v3377_v16, %v3376_v11  ;;  %v3710_v11 = vld [vmem:[%s7691_s3 + $0x68] sm:$0xff] }
 0xbe5   : > { %5679 = vmatpush3.bf16.msra.mxu1 %v5678_v40 }
 0xbe6   : > { %5680 = vmatprep.subr.bf16.mxu1 %v6342_v22 }
 0xbe9   : > { %5682 = vmatpush3.bf16.msra.mxu1 %v5681_v56  ;;  %v5729_v56 = vpack.c.bf16 %v3379_v53, %v3378_v43  ;;  %v4443_v43 = vld [vmem:[%s7691_s3 + $0x80] sm:$0xff]  ;;  %v4444_v53 = vld [vmem:[%s7691_s3 + $0x88] sm:$0xff] }
 0xbea   : > { %5683 = vmatprep.subr.bf16.mxu1 %v6342_v22 }
 0xbed   : > { %5685 = vmatpush3.bf16.msra.mxu1 %v5684_v27  ;;  %v5732_v27 = vpack.c.bf16 %v3381_v26, %v3380_v60  ;;  %v4445_v26 = vld [vmem:[%s7691_s3 + $0x90] sm:$0xff] }
 0xbee   : > { %5250 = vmatprep.subr.mxu1 %v7688_v41 }
 0xca8   : > { %v2642_v31 = vpop.f32.mrb[36].mxu0 }
 0xca9   : > { %v5199_v61 = vpop.f32.mrb[37].mxu0  ;;  %5206 = vmatpush3.msk.msra.mxu0 %vm820_vm0, %v2642_v31 }
 0xcaa   : > { %5208 = vmatmul.mubr.msk.f32.vlgmr.msra.gmra.mrb[40].mxu0 %vm813_vm1, %v4422_v28  ;;  %5210 = vmatprep.subr.mxu0 %v7688_v41 }
 0xcab   : > { %5211 = vmatpush3.msk.msra.mxu0 %vm820_vm0, %v7158_v48  ;;  %5212 = vmatprep.mubr.msk.f32.mxu0 %vm6343_vm3, %v7688_v41 }
 0xcac   : > { %v7285_v5 = vpop.f32.mrb[38].mxu0  ;;  %5255 = vmatprep.subr.mxu0 %v7688_v41 }
 0xcad   : > { %v5204_v15 = vpop.f32.mrb[39].mxu0 }
 0xcb2   : > { %5213 = vmatmul.mubr.msk.f32.vlgmr.msra.gmra.mrb[40].mxu0 %vm813_vm1, %v2730_v1 }
 0xcb3   : > { %5256 = vmatpush3.msk.msra.mxu0 %vm820_vm0, %v7158_v48  ;;  %5257 = vmatprep.mubr.msk.f32.mxu0 %vm6343_vm3, %v7688_v41 }
 0xcb4   : > { %5686 = vmatprep.subr.bf16.mxu0 %v6342_v22 }
 0xcb6   : > { %5258 = vmatmul.mubr.msk.f32.vlgmr.msra.gmra.mrb[42].mxu0 %vm813_vm1, %v4427_v8 }
 0xcb7   : > { %5292 = vmatprep.mubr.msk.f32.mxu0 %vm6343_vm3, %v7688_v41  ;;  %5688 = vmatpush3.bf16.msra.mxu0 %v5687_v36 }
 0xcb8   : > { %5689 = vmatprep.subr.bf16.mxu0 %v6342_v22 }
 0xcbb   : > { %5691 = vmatpush3.bf16.msra.mxu0 %v5690_v13 }
 0xcbc   : > { %5692 = vmatprep.subr.bf16.mxu0 %v6342_v22 }
 0xcbf   : > { %5694 = vmatpush3.bf16.msra.mxu0 %v5693_v63  ;;  %v2726_v63 = vadd.f32 %v7285_v5, %v2651_v45  ;;  %v4451_v45 = vld [vmem:[%s7691_s3 + $0xc0] sm:$0xff] }
 0xcc0   : > { %5695 = vmatprep.subr.bf16.mxu0 %v6342_v22 }
 0xcc3   : > { %5697 = vmatpush3.bf16.msra.mxu0 %v5696_v52 }
 0xcc4   : > { %5698 = vmatprep.subr.bf16.mxu0 %v6342_v22 }
 0xcc7   : > { %5700 = vmatpush3.bf16.msra.mxu0 %v5699_v58 }
 0xcc8   : > { %5701 = vmatprep.subr.bf16.mxu0 %v6342_v22 }
 0xccb   : > { %5703 = vmatpush3.bf16.msra.mxu0 %v5702_v19 }
 0xccc   : > { %5704 = vmatprep.subr.bf16.mxu0 %v6342_v22 }
 0xccf   : > { %5706 = vmatpush3.bf16.msra.mxu0 %v5705_v49  ;;  %v3705_v49 = vld [vmem:[%s7691_s3 + $0x40] sm:$0xff] }
 0xcd0   : > { %5707 = vmatprep.subr.bf16.mxu0 %v6342_v22  ;;  %v5747_v54 = vpack.c.bf16 %v3706_v50, %v3705_v49  ;;  %v4474_v49 = vld [vmem:[%s7691_s3 + $0x170] sm:$0xff]  ;;  %v4475_v50 = vld [vmem:[%s7691_s3 + $0x178] sm:$0xff] }
 0xcd3   : > { %5709 = vmatpush3.bf16.msra.mxu0 %v5708_v6  ;;  %v3709_v6 = vld [vmem:[%s7691_s3 + $0x60] sm:$0xff] }
 0xcd4   : > { %5340 = vmatprep.subr.mxu0 %v7688_v41  ;;  %v5753_v16 = vpack.c.bf16 %v3710_v11, %v3709_v6 }
 0xd85   : > { %v2881_v21 = vpop.f32.mrb[40].mxu0 }
 0xd86   : > { %v5214_v2 = vpop.f32.mrb[41].mxu0  ;;  %5248 = vmatmul.mubr.f32.vlgmr.msra.gmra.mrb[72].mxu1 %v2881_v21 }
 0xd87   : > { %5251 = vmatpush3.msk.msra.mxu1 %vm820_vm0, %v2642_v31  ;;  %5252 = vmatprep.mubr.msk.f32.mxu1 %vm6343_vm3, %v7688_v41 }
 0xd88   : > { %5295 = vmatprep.subr.mxu1 %v7688_v41 }
 0xd89   : > { %v3123_v0 = vpop.f32.mrb[42].mxu0 }
 0xd8a   : > { %5253 = vmatmul.mubr.msk.f32.vlgmr.msra.gmra.mrb[74].mxu1 %vm813_vm1, %v4428_v62  ;;  %v5259_v40 = vpop.f32.mrb[43].mxu0  ;;  %v3542_v62 = vld [vmem:[#allocation16] sm:$0xff] }
 0xd8b   : > { %5296 = vmatpush3.msk.msra.mxu1 %vm820_vm0, %v2642_v31  ;;  %5297 = vmatprep.mubr.msk.f32.mxu1 %vm6343_vm3, %v7688_v41 }
 0xd8c   : > { %5300 = vmatprep.subr.mxu1 %v7688_v41 }
 0xd8e   : > { %5298 = vmatmul.mubr.msk.f32.vlgmr.msra.gmra.mrb[76].mxu1 %vm813_vm1, %v4434_v3 }
 0xd8f   : > { %5301 = vmatpush3.msk.msra.mxu1 %vm820_vm0, %v7158_v48  ;;  %5302 = vmatprep.mubr.msk.f32.mxu1 %vm6343_vm3, %v7688_v41  ;;  %v3370_v48 = vld [vmem:[#allocation13 + $0x120] sm:$0xff] }
 0xd90   : > { %5710 = vmatprep.subr.bf16.mxu1 %v6342_v22  ;;  %v5717_v24 = vpack.c.bf16 %v3371_v18, %v3370_v48  ;;  %v3953_v48 = vld [vmem:[#allocation18 + $0x10] sm:$0xff] }
 0xd96   : > { %5303 = vmatmul.mubr.msk.f32.vlgmr.msra.gmra.mrb[76].mxu1 %vm813_vm1, %v4433_v9  ;;  %v3790_v9 = vld [vmem:[#allocation18 + $0x8] sm:$0xff] }
 0xd97   : > { %5712 = vmatpush3.bf16.msra.mxu1 %v5711_v30  ;;  %5337 = vmatprep.mubr.msk.f32.mxu1 %vm6343_vm3, %v7688_v41  ;;  %v3623_v30 = vld [vmem:[#allocation18] sm:$0xff] }
 0xd98   : > { %5713 = vmatprep.subr.bf16.mxu1 %v6342_v22 }
 0xd9b   : > { %5715 = vmatpush3.bf16.msra.mxu1 %v5714_v17  ;;  %v3700_v17 = vld [vmem:[%s7691_s3 + $0x18] sm:$0xff] }
 0xd9c   : > { %5716 = vmatprep.subr.bf16.mxu1 %v6342_v22  ;;  %v5738_v18 = vpack.c.bf16 %v3700_v17, %v3699_v34  ;;  %v4468_v17 = vld [vmem:[%s7691_s3 + $0x140] sm:$0xff] }
 0xd9f   : > { %5718 = vmatpush3.bf16.msra.mxu1 %v5717_v24  ;;  %v3701_v24 = vld [vmem:[%s7691_s3 + $0x20] sm:$0xff] }
 0xda0   : > { %5719 = vmatprep.subr.bf16.mxu1 %v6342_v22  ;;  %v5741_v35 = vpack.c.bf16 %v3702_v25, %v3701_v24  ;;  %v4470_v24 = vld [vmem:[%s7691_s3 + $0x150] sm:$0xff]  ;;  %v4471_v25 = vld [vmem:[%s7691_s3 + $0x158] sm:$0xff] }
 0xda3   : > { %5721 = vmatpush3.bf16.msra.mxu1 %v5720_v42  ;;  %v3703_v42 = vld [vmem:[%s7691_s3 + $0x30] sm:$0xff] }
 0xda4   : > { %5722 = vmatprep.subr.bf16.mxu1 %v6342_v22  ;;  %v5744_v47 = vpack.c.bf16 %v3704_v46, %v3703_v42  ;;  %v4472_v42 = vld [vmem:[%s7691_s3 + $0x160] sm:$0xff]  ;;  %v4473_v46 = vld [vmem:[%s7691_s3 + $0x168] sm:$0xff] }
 0xda7   : > { %5724 = vmatpush3.bf16.msra.mxu1 %v5723_v55  ;;  %v3707_v55 = vld [vmem:[%s7691_s3 + $0x50] sm:$0xff] }
 0xda8   : > { %5725 = vmatprep.subr.bf16.mxu1 %v6342_v22  ;;  %v5750_v4 = vpack.c.bf16 %v3708_v57, %v3707_v55  ;;  %v3547_v55 = vpop.permute.xlu0 %3546 }
 0xdab   : > { %5727 = vmatpush3.bf16.msra.mxu1 %v5726_v33  ;;  %v3712_v33 = vld [vmem:[%s7691_s3 + $0x78] sm:$0xff] }
 0xdac   : > { %5728 = vmatprep.subr.bf16.mxu1 %v6342_v22  ;;  %v3786_v57 = vpop.permute.xlu0 %3785 }
 0xdaf   : > { %5730 = vmatpush3.bf16.msra.mxu1 %v5729_v56  ;;  %v5759_v56 = vpack.c.bf16 %v4444_v53, %v4443_v43 }
 0xdb0   : > { %5731 = vmatprep.subr.bf16.mxu1 %v6342_v22 }
 0xdb3   : > { %5733 = vmatpush3.bf16.msra.mxu1 %v5732_v27  ;;  %v4446_v27 = vld [vmem:[%s7691_s3 + $0x98] sm:$0xff] }
 0xdb4   : > { %5390 = vmatprep.subr.mxu1 %v7688_v41 }
 0xe59   : > { %v2967_v28 = vpop.f32.mrb[72].mxu1 }
 0xe5a   : > { %v5249_v31 = vpop.f32.mrb[73].mxu1  ;;  %v2976_v38 = vadd.f32 %v2974_v37, %v2967_v28 }
 0xe5d   : > { %v3050_v61 = vpop.f32.mrb[74].mxu1 }
 0xe5e   : > { %v3124_v15 = vadd.f32 %v3123_v0, %v3050_v61  ;;  %v5254_v1 = vpop.f32.mrb[75].mxu1  ;;  %v3711_v0 = vld [vmem:[%s7691_s3 + $0x70] sm:$0xff] }
 0xe5f   : > { %v5756_v40 = vpack.c.bf16 %v3712_v33, %v3711_v0 }
 0xe60   : > { %5293 = vmatmul.mubr.f32.vlgmr.msra.gmra.mrb[44].mxu0 %v3124_v15  ;;  %v5762_v15 = vpack.c.bf16 %v4446_v27, %v4445_v26 }
 0xe61   : > { %5342 = vmatprep.mubr.msk.f32.mxu0 %vm6343_vm3, %v7688_v41 }
 0xe69   : > { %v3361_v8 = vpop.f32.mrb[76].mxu1 }
 0xe6a   : > { %v5304_v32 = vpop.f32.mrb[77].mxu1  ;;  %5338 = vmatmul.mubr.f32.vlgmr.msra.gmra.mrb[78].mxu1 %v3361_v8  ;;  %v4447_v8 = vld [vmem:[%s7691_s3 + $0xa0] sm:$0xff] }
 0xe6b   : > { %5392 = vmatprep.mubr.msk.f32.mxu1 %vm6343_vm3, %v7688_v41  ;;  %v4448_v32 = vld [vmem:[%s7691_s3 + $0xa8] sm:$0xff] }
 0xf33   : > { %v3210_v36 = vpop.f32.mrb[44].mxu0 }
 0xf34   : > { %v3214_v44 = vadd.f32 %v3210_v36, %v2976_v38  ;;  %v5294_v13 = vpop.f32.mrb[45].mxu0  ;;  %v5765_v38 = vpack.c.bf16 %v4448_v32, %v4447_v8  ;;  %v4449_v36 = vld [vmem:[%s7691_s3 + $0xb0] sm:$0xff] }
 0xf3d   : > { %v3448_v14 = vpop.f32.mrb[78].mxu1 }
 0xf3e   : > { %v3452_v51 = vadd.f32 %v3448_v14, %v3214_v44  ;;  %v5339_v39 = vpop.f32.mrb[79].mxu1  ;;  %v4450_v44 = vld [vmem:[%s7691_s3 + $0xb8] sm:$0xff]  ;;  %v4452_v14 = vld [vmem:[%s7691_s3 + $0xc8] sm:$0xff] }
 0xf3f   : > { %v5768_v13 = vpack.c.bf16 %v4450_v44, %v4449_v36  ;;  %v4454_v39 = vld [vmem:[%s7691_s3 + $0xd8] sm:$0xff] }
 0xf40   : > { %v3453_v52 = vadd.f32 %v3452_v51, %v2726_v63  ;;  %v4453_v51 = vld [vmem:[%s7691_s3 + $0xd0] sm:$0xff] }
 0xf42   : > { %v3455_v12 = vmul.f32 0.1, %v3453_v52  ;;  %vm3454_vm4 = vcmp.ge.f32.partialorder %v3453_v52, 0.0 }
 0xf44   : > { %v3456_v58 = vsel %vm3454_vm4, %v3453_v52, %v3455_v12  ;;  %v5774_v52 = vpack.c.bf16 %v4454_v39, %v4453_v51  ;;  %v4455_v12 = vld [vmem:[%s7691_s3 + $0xe0] sm:$0xff] }
 0xf45   : > { %5341 = vmatpush3.msra.mxu0 %v3456_v58 }
 0xf46   : > { %5343 = vmatmul.mubr.msk.f32.vlgmr.msra.gmra.mrb[46].mxu0 %vm3464_vm5, %v3457_v20  ;;  %5345 = vmatprep.subr.mxu0 %v7688_v41  ;;  %v4456_v20 = vld [vmem:[%s7691_s3 + $0xe8] sm:$0xff] }
 0xf47   : > { %5347 = vmatprep.mubr.msk.f32.mxu0 %vm6343_vm3, %v7688_v41  ;;  %v5777_v58 = vpack.c.bf16 %v4456_v20, %v4455_v12 }
0x1019   : > { %v3534_v59 = vpop.f32.mrb[46].mxu0 }
0x101a   : > { %v3535_v19 = vadd.f32 %v3534_v59, %v3462_v29  ;;  %v5344_v5 = vpop.f32.mrb[47].mxu0  ;;  %v4457_v29 = vld [vmem:[%s7691_s3 + $0xf0] sm:$0xff]  ;;  %v4458_v59 = vld [vmem:[%s7691_s3 + $0xf8] sm:$0xff] }
0x101b   : > { %v4460_v5 = vld [vmem:[%s7691_s3 + $0x100] sm:$0xff] }
0x101c   : > { %v3538_v21 = vadd.f32 %v3535_v19, %v2726_v63  ;;  %v5771_v63 = vpack.c.bf16 %v4452_v14, %v4451_v45  ;;  %v5780_v19 = vpack.c.bf16 %v4458_v59, %v4457_v29 }
0x101e   : > { %v3540_v2 = vmul.f32 0.1, %v3538_v21  ;;  %vm3539_vm6 = vcmp.ge.f32.partialorder %v3538_v21, 0.0 }
0x1020   : > { %v3541_v3 = vsel %vm3539_vm6, %v3538_v21, %v3540_v2  ;;  %v4461_v21 = vld [vmem:[%s7691_s3 + $0x108] sm:$0xff] }
0x1021   : > { %5346 = vmatpush3.msra.mxu0 %v3541_v3  ;;  %5391 = vmatpush3.msra.mxu1 %v3541_v3  ;;  %v5783_v2 = vpack.c.bf16 %v4461_v21, %v4460_v5 }
0x1022   : > { %5348 = vmatmul.mubr.msk.f32.vlgmr.msra.gmra.mrb[48].mxu0 %vm3464_vm5, %v3542_v62  ;;  %5350 = vmatprep.subr.mxu0 %v7688_v41  ;;  %v4462_v62 = vld [vmem:[%s7691_s3 + $0x110] sm:$0xff] }
0x1023   : > { %5430 = vmatprep.subr.mxu1 %v7688_v41  ;;  %5351 = vmatpush3.msra.mxu0 %v3541_v3 }
0x1024   : > { %5393 = vmatmul.mubr.msk.f32.vlgmr.msra.gmra.mrb[80].mxu1 %vm3464_vm5, %v3790_v9  ;;  %5352 = vmatprep.mubr.msk.f32.mxu0 %vm6343_vm3, %v7688_v41  ;;  %v4465_v9 = vld [vmem:[%s7691_s3 + $0x128] sm:$0xff] }
0x1025   : > { %5431 = vmatpush3.msra.mxu1 %v3541_v3  ;;  %5432 = vmatprep.mubr.msk.f32.mxu1 %vm6343_vm3, %v7688_v41  ;;  %v4463_v3 = vld [vmem:[%s7691_s3 + $0x118] sm:$0xff] }
0x1026   : > { %5353 = vmatmul.mubr.msk.f32.vlgmr.msra.gmra.mrb[50].mxu0 %vm3464_vm5, %v3623_v30  ;;  %5734 = vmatprep.subr.bf16.mxu0 %v6342_v22  ;;  %v5786_v23 = vpack.c.bf16 %v4463_v3, %v4462_v62  ;;  %v5789_v30 = vpack.c.bf16 %v4465_v9, %v4464_v7 }
0x1027   : > { %5736 = vmatpush3.bf16.msra.mxu0 %v5735_v10  ;;  %5387 = vmatprep.mubr.msk.f32.mxu0 %vm6343_vm3, %v7688_v41  ;;  %v4466_v10 = vld [vmem:[%s7691_s3 + $0x130] sm:$0xff] }
0x1028   : > { %5433 = vmatmul.mubr.msk.f32.vlgmr.msra.gmra.mrb[82].mxu1 %vm3464_vm5, %v3953_v48  ;;  %5737 = vmatprep.subr.bf16.mxu0 %v6342_v22  ;;  %v4469_v48 = vld [vmem:[%s7691_s3 + $0x148] sm:$0xff] }
0x102b   : > { %5739 = vmatpush3.bf16.msra.mxu0 %v5738_v18  ;;  %v5795_v18 = vpack.c.bf16 %v4469_v48, %v4468_v17 }
0x102c   : > { %5740 = vmatprep.subr.bf16.mxu0 %v6342_v22 }
0x102f   : > { %5742 = vmatpush3.bf16.msra.mxu0 %v5741_v35  ;;  %v5798_v35 = vpack.c.bf16 %v4471_v25, %v4470_v24 }
0x1030   : > { %5743 = vmatprep.subr.bf16.mxu0 %v6342_v22 }
0x1033   : > { %5745 = vmatpush3.bf16.msra.mxu0 %v5744_v47  ;;  %v5801_v47 = vpack.c.bf16 %v4473_v46, %v4472_v42 }
0x1034   : > { %5746 = vmatprep.subr.bf16.mxu0 %v6342_v22 }
0x1037   : > { %5748 = vmatpush3.bf16.msra.mxu0 %v5747_v54  ;;  %v5804_v54 = vpack.c.bf16 %v4475_v50, %v4474_v49 }
0x1038   : > { %5749 = vmatprep.subr.bf16.mxu0 %v6342_v22 }
0x103b   : > { %5751 = vmatpush3.bf16.msra.mxu0 %v5750_v4  ;;  %v5807_v4 = vadd.f32 %v3786_v57, %v3547_v55 }
0x103c   : > { %5752 = vmatprep.subr.bf16.mxu0 %v6342_v22 }
0x103f   : > { %5754 = vmatpush3.bf16.msra.mxu0 %v5753_v16 }
0x1040   : > { %5755 = vmatprep.subr.bf16.mxu0 %v6342_v22 }
0x1043   : > { %5757 = vmatpush3.bf16.msra.mxu0 %v5756_v40 }
0x1044   : > { %5758 = vmatprep.subr.bf16.mxu0 %v6342_v22 }
0x10f7   : > { %v3860_v60 = vpop.f32.mrb[80].mxu1 }
0x10f8   : > { %v5394_v28 = vpop.f32.mrb[81].mxu1 }
0x10f9   : > { %v3693_v31 = vpop.f32.mrb[50].mxu0 }
0x10fa   : > { %5388 = vmatmul.mubr.f32.vlgmr.msra.gmra.mrb[48].mxu0 %v3693_v31  ;;  %v5354_v61 = vpop.f32.mrb[51].mxu0 }
0x10fb   : > { %5760 = vmatpush3.bf16.msra.mxu0 %v5759_v56  ;;  %5427 = vmatprep.mubr.msk.f32.mxu0 %vm6343_vm3, %v7688_v41  ;;  %v7438_v1 = vpop.f32.mrb[82].mxu1 }
0x10fc   : > { %5761 = vmatprep.subr.bf16.mxu0 %v6342_v22  ;;  %v5434_v37 = vpop.f32.mrb[83].mxu1 }
0x10ff   : > { %5763 = vmatpush3.bf16.msra.mxu0 %v5762_v15 }
0x1100   : > { %5764 = vmatprep.subr.bf16.mxu0 %v6342_v22 }
0x1103   : > { %5766 = vmatpush3.bf16.msra.mxu0 %v5765_v38 }
0x1104   : > { %5767 = vmatprep.subr.bf16.mxu0 %v6342_v22 }
0x1107   : > { %5769 = vmatpush3.bf16.msra.mxu0 %v5768_v13 }
0x1108   : > { %5770 = vmatprep.subr.bf16.mxu0 %v6342_v22 }
0x110b   : > { %5772 = vmatpush3.bf16.msra.mxu0 %v5771_v63 }
0x110c   : > { %5773 = vmatprep.subr.bf16.mxu0 %v6342_v22 }
0x110f   : > { %5775 = vmatpush3.bf16.msra.mxu0 %v5774_v52 }
0x1110   : > { %5776 = vmatprep.subr.bf16.mxu0 %v6342_v22 }
0x1113   : > { %5778 = vmatpush3.bf16.msra.mxu0 %v5777_v58 }
0x1114   : > { %5779 = vmatprep.subr.bf16.mxu0 %v6342_v22 }
0x1117   : > { %5781 = vmatpush3.bf16.msra.mxu0 %v5780_v19 }
0x1118   : > { %5782 = vmatprep.subr.bf16.mxu0 %v6342_v22 }
0x111a   : > { %5428 = vmatmul.mubr.f32.vlgmr.msra.gmra.mrb[48].mxu0 %v3860_v60 }
0x111b   : > { %5784 = vmatpush3.bf16.msra.mxu0 %v5783_v2  ;;  %5467 = vmatprep.mubr.msk.f32.mxu0 %vm6343_vm3, %v7688_v41  ;;  %v4467_v41 = vld [vmem:[%s7691_s3 + $0x138] sm:$0xff] }
0x111c   : > { %5785 = vmatprep.subr.bf16.mxu0 %v6342_v22  ;;  %v5792_v34 = vpack.c.bf16 %v4467_v41, %v4466_v10 }
0x111f   : > { %5787 = vmatpush3.bf16.msra.mxu0 %v5786_v23 }
0x1120   : > { %5788 = vmatprep.subr.bf16.mxu0 %v6342_v22 }
0x1123   : > { %5790 = vmatpush3.bf16.msra.mxu0 %v5789_v30 }
0x1124   : > { %5791 = vmatprep.subr.bf16.mxu0 %v6342_v22 }
0x1127   : > { %5793 = vmatpush3.bf16.msra.mxu0 %v5792_v34 }
0x1128   : > { %5794 = vmatprep.subr.bf16.mxu0 %v6342_v22 }
0x112b   : > { %5796 = vmatpush3.bf16.msra.mxu0 %v5795_v18 }
0x112c   : > { %5797 = vmatprep.subr.bf16.mxu0 %v6342_v22 }
0x112f   : > { %5799 = vmatpush3.bf16.msra.mxu0 %v5798_v35 }
0x1130   : > { %5800 = vmatprep.subr.bf16.mxu0 %v6342_v22 }
0x1133   : > { %5802 = vmatpush3.bf16.msra.mxu0 %v5801_v47 }
0x1134   : > { %5803 = vmatprep.subr.bf16.mxu0 %v6342_v22 }
0x1137   : > { %5805 = vmatpush3.bf16.msra.mxu0 %v5804_v54 }
0x113a   : > { %5468 = vmatmul.mubr.f32.vlgmr.msra.gmra.mrb[48].mxu0 %v7438_v1 }
0x120d   : > { %v4110_v6 = vpop.f32.mrb[48].mxu0 }
0x120e   : > { %v5808_v11 = vadd.f32 %v5807_v4, %v4110_v6  ;;  %v5469_v16 = vpop.f32.mrb[49].mxu0 }
0x1210   : > { %vm4116_vm7 = vcmp.ge.f32.partialorder %v5808_v11, 0.0  ;;  %v4117_v0 = vmul.f32 0.1, %v5808_v11 }
0x1212   : > { %v4118_v22 = vsel %vm4116_vm7, %v5808_v11, %v4117_v0 }
0x1213   : > { %4119 = vst [vmem:[%s795_s30] sm:$0xff] %v4118_v22 }
0x1214   : > { %6254 = shalt.err (!%p6251_p3)
}
0x1215   : > { %s6255_s20 = scalar_lea.hbm %s7547_s15, 128  ;;  %s6259_s12 = scalar_lea.hbm %s7692_s17, 256 }
0x1216   : > { %p6256_p10 = scmp.ne.s32.totalorder %s7547_s15, %s6255_s20  ;;  %p6260_p11 = scmp.lt.u32.totalorder %s7547_s15, %s7692_s17 }
0x1217   : > { %p6261_p9 = scmp.lt.u32.totalorder %s6259_s12, %s6255_s20  ;;  %p6263_p0 = scmp.lt.u32.totalorder %s6255_s20, %s7547_s15 }
0x1218   : > { %p6257_p4 = pnand %p6256_p10, %p7693_p2 }
0x1219   : > { %p6262_p12 = por %p6261_p9, %p6260_p11 }
0x121a   : > { %p6258_p1 = pneg %p6257_p4 }
0x121b   : > { %p6264_p5 = por %p6263_p0, %p6262_p12 }
0x121d   : > { %p6265_p13 = pnand %p6264_p5, %p6258_p1 }
0x121f   : > { %6268 = shalt.err (!%p6265_p13)
}
0x1220   : > { %5857 = dma.vmem_to_hbm [thread:$0]  (%p7693_p2), %s7549_s21, 128, %s7547_s15, %s4121_s5  }
0x1221 PF: > { %s4146_s1 = sand.u32 1, %s6315_s2   ;;  %p7694_p8 = scmp.ne.s32.totalorder %s7662_s28, 0 }
0x1222   : > { %p7695_p7 = scmp.ge.s32.totalorder %s6327_s27, 2  ;;  %s4147_s8 = scalar_lea.sflag [#allocation4], %s4146_s1 }
0x1224   : > { %p5892_p6 = pnand %p7695_p7, %p7694_p8 }
0x1226   : > { %6310 = dma.done.wait (!%p5892_p6), %s4147_s8, 128  }
0x1227   : > { %6312 = vsyncadd (!%p5892_p6), %s4147_s8, 4294967168  ;;  %p39_p3 = scmp.ge.s32.totalorder %s6683_s4, 4   ;;  %s7696_s2 = smov %s6319_s25 }
0x1228   : > { %s7697_s25 = smov %s6323_s26  ;;  %s7698_s26 = smov %s6695_s22 }
0x1229   : > { %s7699_s27 = smov %s6683_s4  ;;  %41 = sbr.rel (!%p39_p3) target bundleno = 28 (0x1c), region = 198 }
0x1230   :  { %4152 = vsyncpa [#allocation3], 1 }
0x1231   :  { %4154 = vsyncpa [#allocation3 + $0x1], 1 }
0x1232   :  { %4155 = vsyncpa [#allocation8], 1 }
0x1233   :  { %4156 = vsyncpa [#allocation11], 1 }
0x1234   :  { %4157 = vsyncpa [#allocation14], 1 }
0x1235   :  { %4158 = vsyncpa [#allocation17], 1 }
0x1236   :  { %4159 = vsyncpa [#allocation4], 1 }
0x1237   :  { %4161 = vsyncpa [#allocation4 + $0x1], 1 }
0x1238   :  { %4162 = vsyncpa [#allocation5], 1 }
0x1239   :  { %4164 = vsyncpa [#allocation5 + $0x1], 1 }

</bundles_post_ra>
